<compile_context>
chip_gen: v7x
topology: tpu7x:2x2x1
jax: 0.10.0
libtpu: 0.0.40
codegen_flags: <defaults>
</compile_context>

<pallas_src>
import functools

import jax
import jax.numpy as jnp
import numpy as np
from jax.experimental import pallas as pl
from jax.experimental.pallas import tpu as pltpu


def _pack_transposed_conv_weight(W):
    """PyTorch ConvTranspose2d weight (Cin, Cout, 3, 3) -> (4*Cin, 4*Cout) phase matrix."""
    Cin, Cout = W.shape[0], W.shape[1]
    Z = jnp.zeros((Cin, Cout), W.dtype)
    w = lambda ky, kx: W[:, :, ky, kx]
    # row blocks: [x[m,n], x[m,n+1], x[m+1,n], x[m+1,n+1]]
    col_ee = jnp.concatenate([w(1, 1), Z,       Z,       Z      ], axis=0)  # (even,even)
    col_eo = jnp.concatenate([w(1, 2), w(1, 0), Z,       Z      ], axis=0)  # (even,odd)
    col_oe = jnp.concatenate([w(2, 1), Z,       w(0, 1), Z      ], axis=0)  # (odd,even)
    col_oo = jnp.concatenate([w(2, 2), w(2, 0), w(0, 2), w(0, 0)], axis=0)  # (odd,odd)
    return jnp.concatenate([col_ee, col_eo, col_oe, col_oo], axis=1)


def _fused_kernel(p_ref, w_ref, gamma_ref, beta_ref, g_ref, gt_ref,   # inputs
                  o_ref,                                              # output
                  sum_ref, ssq_ref, scale_ref, shift_ref,             # scratch
                  *, inv_count, eps):
    phase = pl.program_id(0)
    i = pl.program_id(1)
    tm = p_ref.shape[0]

    # Transposed conv as a (tile_m, 4*Cin) x (4*Cin, 4*Cout) matmul. bf16 in, f32 out.
    y = jnp.dot(p_ref[...], w_ref[...], preferred_element_type=jnp.float32)

    @pl.when(jnp.logical_and(phase == 0, i == 0))
    def _():
        sum_ref[...] = jnp.zeros(sum_ref.shape, jnp.float32)
        ssq_ref[...] = jnp.zeros(ssq_ref.shape, jnp.float32)

    @pl.when(phase == 0)
    def _():
        # Column sums on the MXU (it is otherwise nearly idle).  All 8 accumulator rows
        # hold identical copies of the per-column sum.
        ones = jnp.ones((8, tm), jnp.float32)
        sum_ref[...] += jnp.dot(ones, y, preferred_element_type=jnp.float32)
        ssq_ref[...] += jnp.dot(ones, y * y, preferred_element_type=jnp.float32)

    @pl.when(jnp.logical_and(phase == 1, i == 0))
    def _():
        # Finalize BN: merge the 4 phase column-groups per channel (G: (4C, C) 0/1
        # matrix), then broadcast per-channel scale/shift back to the packed layout (GT).
        sum_c = jnp.dot(sum_ref[...], g_ref[...], preferred_element_type=jnp.float32)  # (8, C)
        ssq_c = jnp.dot(ssq_ref[...], g_ref[...], preferred_element_type=jnp.float32)  # (8, C)
        mean = sum_c * inv_count
        var = ssq_c * inv_count - mean * mean
        inv = gamma_ref[...] * jax.lax.rsqrt(var + eps)        # (8, C)
        shf = beta_ref[...] - mean * inv                       # (8, C)
        scale_ref[...] = jnp.dot(inv, gt_ref[...], preferred_element_type=jnp.float32)[0:1, :]
        shift_ref[...] = jnp.dot(shf, gt_ref[...], preferred_element_type=jnp.float32)[0:1, :]

    @pl.when(phase == 1)
    def _():
        z = y * scale_ref[...] + shift_ref[...]
        o_ref[...] = z * (1.0 / (1.0 + jnp.exp(-z)))


@functools.partial(jax.jit, static_argnames=("tile_m",))
def decoder_block_forward(x_nchw, params, *, tile_m=512):
    W = params["w"]
    gamma, beta = params["gamma"], params["beta"]
    # params["b"] is intentionally unused by the kernel: training-mode BatchNorm subtracts
    # the batch mean, so the per-channel ConvTranspose bias cancels exactly in the output.
    eps = 1e-5

    N, Cin, H, Wd = x_nchw.shape
    Cout = W.shape[1]
    K = 4 * Cin
    Nc = 4 * Cout
    M = N * H * Wd

    # Tile size: largest divisor of M (halving the request) — demo shapes are powers of 2.
    tm = min(tile_m, M)
    while M % tm != 0:
        tm //= 2
    # TODO(synk): general N,H,W need a cdiv grid plus row masking instead of this assert.
    assert tm == M or tm % 8 == 0
    n_tiles = M // tm

    # --- glue: patch matrix (im2col for the sub-pixel decomposition), built in bf16 ---
    # TODO(synk): the patch build and the final NCHW repack are pure XLA layout copies;
    # they could be folded into the kernel (halo'd in_specs / NHWC output) if profiled hot.
    x = jnp.transpose(x_nchw, (0, 2, 3, 1)).astype(jnp.bfloat16)      # NHWC, bf16
    xp = jnp.pad(x, ((0, 0), (0, 1), (0, 1), (0, 0)))                 # zero row/col at far edge
    A = xp[:, :H, :Wd, :]
    B = xp[:, :H, 1:, :]
    C = xp[:, 1:, :Wd, :]
    D = xp[:, 1:, 1:, :]
    P = jnp.concatenate([A, B, C, D], axis=-1).reshape(M, K)

    Wm = _pack_transposed_conv_weight(W).astype(jnp.bfloat16)         # (4*Cin, 4*Cout)
    gamma2 = gamma.reshape(1, Cout).astype(jnp.float32)
    beta2 = beta.reshape(1, Cout).astype(jnp.float32)

    # Group-sum matrices: G (4C, C) merges the 4 phase column groups per channel,
    # GT (C, 4C) broadcasts per-channel scale/shift back to the packed 4C layout.
    G = (jnp.arange(Nc)[:, None] % Cout == jnp.arange(Cout)[None, :]).astype(jnp.float32)
    GT = jnp.transpose(G)

    kernel = functools.partial(_fused_kernel, inv_count=1.0 / float(4 * M), eps=eps)

    out4 = pl.pallas_call(
        kernel,
        out_shape=jax.ShapeDtypeStruct((M, Nc), jnp.float32),
        grid_spec=pltpu.PrefetchScalarGridSpec(
            num_scalar_prefetch=0,
            grid=(2, n_tiles),                               # (phase, M-tiles)
            in_specs=[
                pl.BlockSpec((tm, K), lambda p, i: (i, 0)),      # patch tile (read each phase)
                pl.BlockSpec((K, Nc), lambda p, i: (0, 0)),      # packed weight, resident
                pl.BlockSpec((1, Cout), lambda p, i: (0, 0)),    # gamma, resident
                pl.BlockSpec((1, Cout), lambda p, i: (0, 0)),    # beta, resident
                pl.BlockSpec((Nc, Cout), lambda p, i: (0, 0)),   # G, resident
                pl.BlockSpec((Cout, Nc), lambda p, i: (0, 0)),   # GT, resident
            ],
            # During phase 0 the output block index stays (0, 0) and is never written, so
            # no garbage is flushed to HBM; phase 1 writes each row-block exactly once.
            out_specs=pl.BlockSpec((tm, Nc), lambda p, i: (p * i, 0)),
            scratch_shapes=[
                pltpu.VMEM((8, Nc), jnp.float32),   # sum accumulator
                pltpu.VMEM((8, Nc), jnp.float32),   # sum-of-squares accumulator
                pltpu.VMEM((1, Nc), jnp.float32),   # BN scale (packed 4C layout)
                pltpu.VMEM((1, Nc), jnp.float32),   # BN shift (packed 4C layout)
            ],
        ),
        compiler_params=pltpu.CompilerParams(
            # Both axes carry cross-iteration state (stats accumulator / phase ordering).
            # TODO(synk): v7x megacore split needs per-core partial stats plus a
            # cross-core combine between the phases; left single-core here.
            dimension_semantics=("arbitrary", "arbitrary"),
        ),
    )(P, Wm, gamma2, beta2, G, GT)

    # --- glue: pixel-shuffle the 4 phases back to the 2x upsampled image, NCHW ---
    out = out4.reshape(N, H, Wd, 2, 2, Cout)        # (n, h, w, py, px, c)
    out = jnp.transpose(out, (0, 5, 1, 3, 2, 4))    # (n, c, h, py, w, px)
    return out.reshape(N, Cout, 2 * H, 2 * Wd)


# ---------------------------------------------------------------------------
# Pure-JAX reference (matches PyTorch ConvTranspose2d + train-mode BN + Swish).
# ---------------------------------------------------------------------------
def _reference(x_nchw, W, b, gamma, beta, eps=1e-5):
    x = jnp.transpose(x_nchw, (0, 2, 3, 1))
    k = jnp.transpose(W[:, :, ::-1, ::-1], (2, 3, 0, 1))          # (kH,kW,Cin,Cout)
    y = jax.lax.conv_general_dilated(
        x, k, window_strides=(1, 1),
        padding=((1, 2), (1, 2)), lhs_dilation=(2, 2),
        dimension_numbers=("NHWC", "HWIO", "NHWC"),
        precision=jax.lax.Precision.HIGHEST,
    ) + b[None, None, None, :]
    mean = jnp.mean(y, axis=(0, 1, 2))
    var = jnp.mean((y - mean) ** 2, axis=(0, 1, 2))
    z = (y - mean) / jnp.sqrt(var + eps) * gamma + beta
    out = z * jax.nn.sigmoid(z)
    return jnp.transpose(out, (0, 3, 1, 2))


if __name__ == "__main__":
    key = jax.random.PRNGKey(0)
    channels = [8, 32]              # DecoderBlock(channels): channels[0] -> channels[1]
    N, H, Wd = 2, 32, 32            # M = 2048 -> 4 row-tiles of 512

    k1, k2, k3 = jax.random.split(key, 3)
    x = jax.random.normal(k1, (N, channels[0], H, Wd), jnp.float32)
    Wt = jax.random.normal(k2, (channels[0], channels[1], 3, 3), jnp.float32) * 0.1
    b = jax.random.normal(k3, (channels[1],), jnp.float32) * 0.1
    gamma = jnp.ones((channels[1],), jnp.float32)    # BatchNorm2d default init
    beta = jnp.zeros((channels[1],), jnp.float32)
    params = dict(w=Wt, b=b, gamma=gamma, beta=beta)

    out = jax.block_until_ready(decoder_block_forward(x, params))
    assert out.shape == (N, channels[1], 2 * H, 2 * Wd)

    ref = _reference(x, Wt, b, gamma, beta)
    # bf16 matmul inputs => slightly relaxed tolerance vs the f32 reference.
    np.testing.assert_allclose(np.asarray(out), np.asarray(ref), rtol=2e-2, atol=2e-2)
    print("KERNEL_OK")
</pallas_src>

<mosaic_0001>
module attributes {stable_mosaic.version = 11 : i64} {
  func.func @_fused_kernel(%arg0: i32, %arg1: i32, %arg2: memref<512x32xbf16, #tpu.memory_space<vmem>>, %arg3: memref<32x128xbf16, #tpu.memory_space<vmem>>, %arg4: memref<1x32xf32, #tpu.memory_space<vmem>>, %arg5: memref<1x32xf32, #tpu.memory_space<vmem>>, %arg6: memref<128x32xf32, #tpu.memory_space<vmem>>, %arg7: memref<32x128xf32, #tpu.memory_space<vmem>>, %arg8: memref<512x128xf32, #tpu.memory_space<vmem>>, %arg9: memref<8x128xf32, #tpu.memory_space<vmem>>, %arg10: memref<8x128xf32, #tpu.memory_space<vmem>>, %arg11: memref<1x128xf32, #tpu.memory_space<vmem>>, %arg12: memref<1x128xf32, #tpu.memory_space<vmem>>) attributes {dimension_semantics = [#tpu.dimension_semantics<arbitrary>, #tpu.dimension_semantics<arbitrary>], iteration_bounds = array<i64: 2, 4>, scalar_prefetch = 0 : i64, scratch_operands = 4 : i64, tpu.core_type = #tpu.core_type<tc>, window_params = [{transform_indices = @transform_0, window_bounds = array<i64: 512, 32>}, {pipeline_mode = #tpu.pipeline_mode<synchronous>, transform_indices = @transform_1, window_bounds = array<i64: 32, 128>}, {pipeline_mode = #tpu.pipeline_mode<synchronous>, transform_indices = @transform_2, window_bounds = array<i64: 1, 32>}, {pipeline_mode = #tpu.pipeline_mode<synchronous>, transform_indices = @transform_3, window_bounds = array<i64: 1, 32>}, {pipeline_mode = #tpu.pipeline_mode<synchronous>, transform_indices = @transform_4, window_bounds = array<i64: 128, 32>}, {pipeline_mode = #tpu.pipeline_mode<synchronous>, transform_indices = @transform_5, window_bounds = array<i64: 32, 128>}, {transform_indices = @transform_6, window_bounds = array<i64: 512, 128>}]} {
    %c0 = arith.constant 0 : index
    %c0_0 = arith.constant 0 : index
    %0 = vector.load %arg2[%c0, %c0_0] : memref<512x32xbf16, #tpu.memory_space<vmem>>, vector<512x32xbf16>
    %c0_1 = arith.constant 0 : index
    %c0_2 = arith.constant 0 : index
    %1 = vector.load %arg3[%c0_1, %c0_2] : memref<32x128xbf16, #tpu.memory_space<vmem>>, vector<32x128xbf16>
    %cst = arith.constant dense<0.000000e+00> : vector<512x128xf32>
    %2 = tpu.matmul %0, %1, %cst {dimension_numbers = #tpu.dot_dimension_numbers<[1], [0], [0], [1], [0, 0, 1, 1], [], []>} : vector<512x32xbf16>, vector<32x128xbf16>, vector<512x128xf32> -> vector<512x128xf32>
    %c0_i32 = arith.constant 0 : i32
    %3 = arith.cmpi eq, %arg0, %c0_i32 : i32
    %c0_i32_3 = arith.constant 0 : i32
    %4 = arith.cmpi eq, %arg1, %c0_i32_3 : i32
    %5 = arith.andi %3, %4 : i1
    %6 = arith.extui %5 : i1 to i32
    %c0_i32_4 = arith.constant 0 : i32
    %7 = arith.cmpi ne, %6, %c0_i32_4 : i32
    scf.if %7 {
      %cst_11 = arith.constant 0.000000e+00 : f32
      %19 = vector.broadcast %cst_11 : f32 to vector<8x128xf32>
      %c0_12 = arith.constant 0 : index
      %c0_13 = arith.constant 0 : index
      %20 = vector.load %arg9[%c0_12, %c0_13] : memref<8x128xf32, #tpu.memory_space<vmem>>, vector<8x128xf32>
      tpu.vector_store %arg9[%c0_12, %c0_13], %19 {strides = array<i32>} : memref<8x128xf32, #tpu.memory_space<vmem>>, vector<8x128xf32>,
      %cst_14 = arith.constant 0.000000e+00 : f32
      %21 = vector.broadcast %cst_14 : f32 to vector<8x128xf32>
      %c0_15 = arith.constant 0 : index
      %c0_16 = arith.constant 0 : index
      %22 = vector.load %arg10[%c0_15, %c0_16] : memref<8x128xf32, #tpu.memory_space<vmem>>, vector<8x128xf32>
      tpu.vector_store %arg10[%c0_15, %c0_16], %21 {strides = array<i32>} : memref<8x128xf32, #tpu.memory_space<vmem>>, vector<8x128xf32>,
    } else {
    }
    %c0_i32_5 = arith.constant 0 : i32
    %8 = arith.cmpi eq, %arg0, %c0_i32_5 : i32
    %9 = arith.extui %8 : i1 to i32
    %c0_i32_6 = arith.constant 0 : i32
    %10 = arith.cmpi ne, %9, %c0_i32_6 : i32
    scf.if %10 {
      %cst_11 = arith.constant 1.000000e+00 : f32
      %19 = vector.broadcast %cst_11 : f32 to vector<8x512xf32>
      %c0_12 = arith.constant 0 : index
      %c0_13 = arith.constant 0 : index
      %20 = vector.load %arg9[%c0_12, %c0_13] : memref<8x128xf32, #tpu.memory_space<vmem>>, vector<8x128xf32>
      %cst_14 = arith.constant dense<0.000000e+00> : vector<8x128xf32>
      %21 = tpu.matmul %19, %2, %cst_14 {dimension_numbers = #tpu.dot_dimension_numbers<[1], [0], [0], [1], [0, 0, 1, 1], [], []>} : vector<8x512xf32>, vector<512x128xf32>, vector<8x128xf32> -> vector<8x128xf32>
      %22 = arith.addf %20, %21 : vector<8x128xf32>
      %c0_15 = arith.constant 0 : index
      %c0_16 = arith.constant 0 : index
      %23 = vector.load %arg9[%c0_15, %c0_16] : memref<8x128xf32, #tpu.memory_space<vmem>>, vector<8x128xf32>
      tpu.vector_store %arg9[%c0_15, %c0_16], %22 {strides = array<i32>} : memref<8x128xf32, #tpu.memory_space<vmem>>, vector<8x128xf32>,
      %c0_17 = arith.constant 0 : index
      %c0_18 = arith.constant 0 : index
      %24 = vector.load %arg10[%c0_17, %c0_18] : memref<8x128xf32, #tpu.memory_space<vmem>>, vector<8x128xf32>
      %25 = arith.mulf %2, %2 : vector<512x128xf32>
      %cst_19 = arith.constant dense<0.000000e+00> : vector<8x128xf32>
      %26 = tpu.matmul %19, %25, %cst_19 {dimension_numbers = #tpu.dot_dimension_numbers<[1], [0], [0], [1], [0, 0, 1, 1], [], []>} : vector<8x512xf32>, vector<512x128xf32>, vector<8x128xf32> -> vector<8x128xf32>
      %27 = arith.addf %24, %26 : vector<8x128xf32>
      %c0_20 = arith.constant 0 : index
      %c0_21 = arith.constant 0 : index
      %28 = vector.load %arg10[%c0_20, %c0_21] : memref<8x128xf32, #tpu.memory_space<vmem>>, vector<8x128xf32>
      tpu.vector_store %arg10[%c0_20, %c0_21], %27 {strides = array<i32>} : memref<8x128xf32, #tpu.memory_space<vmem>>, vector<8x128xf32>,
    } else {
    }
    %c1_i32 = arith.constant 1 : i32
    %11 = arith.cmpi eq, %arg0, %c1_i32 : i32
    %c0_i32_7 = arith.constant 0 : i32
    %12 = arith.cmpi eq, %arg1, %c0_i32_7 : i32
    %13 = arith.andi %11, %12 : i1
    %14 = arith.extui %13 : i1 to i32
    %c0_i32_8 = arith.constant 0 : i32
    %15 = arith.cmpi ne, %14, %c0_i32_8 : i32
    scf.if %15 {
      %c0_11 = arith.constant 0 : index
      %c0_12 = arith.constant 0 : index
      %19 = vector.load %arg9[%c0_11, %c0_12] : memref<8x128xf32, #tpu.memory_space<vmem>>, vector<8x128xf32>
      %c0_13 = arith.constant 0 : index
      %c0_14 = arith.constant 0 : index
      %20 = vector.load %arg6[%c0_13, %c0_14] : memref<128x32xf32, #tpu.memory_space<vmem>>, vector<128x32xf32>
      %cst_15 = arith.constant dense<0.000000e+00> : vector<8x32xf32>
      %21 = tpu.matmul %19, %20, %cst_15 {dimension_numbers = #tpu.dot_dimension_numbers<[1], [0], [0], [1], [0, 0, 1, 1], [], []>} : vector<8x128xf32>, vector<128x32xf32>, vector<8x32xf32> -> vector<8x32xf32>
      %c0_16 = arith.constant 0 : index
      %c0_17 = arith.constant 0 : index
      %22 = vector.load %arg10[%c0_16, %c0_17] : memref<8x128xf32, #tpu.memory_space<vmem>>, vector<8x128xf32>
      %c0_18 = arith.constant 0 : index
      %c0_19 = arith.constant 0 : index
      %23 = vector.load %arg6[%c0_18, %c0_19] : memref<128x32xf32, #tpu.memory_space<vmem>>, vector<128x32xf32>
      %cst_20 = arith.constant dense<0.000000e+00> : vector<8x32xf32>
      %24 = tpu.matmul %22, %23, %cst_20 {dimension_numbers = #tpu.dot_dimension_numbers<[1], [0], [0], [1], [0, 0, 1, 1], [], []>} : vector<8x128xf32>, vector<128x32xf32>, vector<8x32xf32> -> vector<8x32xf32>
      %cst_21 = arith.constant 1.22070313E-4 : f32
      %25 = vector.broadcast %cst_21 : f32 to vector<8x32xf32>
      %26 = arith.mulf %21, %25 : vector<8x32xf32>
      %cst_22 = arith.constant 1.22070313E-4 : f32
      %27 = vector.broadcast %cst_22 : f32 to vector<8x32xf32>
      %28 = arith.mulf %24, %27 : vector<8x32xf32>
      %29 = arith.mulf %26, %26 : vector<8x32xf32>
      %30 = arith.subf %28, %29 : vector<8x32xf32>
      %c0_23 = arith.constant 0 : index
      %c0_24 = arith.constant 0 : index
      %31 = vector.load %arg4[%c0_23, %c0_24] : memref<1x32xf32, #tpu.memory_space<vmem>>, vector<1x32xf32>
      %cst_25 = arith.constant 9.99999974E-6 : f32
      %32 = vector.broadcast %cst_25 : f32 to vector<8x32xf32>
      %33 = arith.addf %30, %32 : vector<8x32xf32>
      %34 = math.rsqrt %33 : vector<8x32xf32>
      %35 = vector.broadcast %31 : vector<1x32xf32> to vector<8x32xf32>
      %36 = arith.mulf %35, %34 : vector<8x32xf32>
      %c0_26 = arith.constant 0 : index
      %c0_27 = arith.constant 0 : index
      %37 = vector.load %arg5[%c0_26, %c0_27] : memref<1x32xf32, #tpu.memory_space<vmem>>, vector<1x32xf32>
      %38 = arith.mulf %26, %36 : vector<8x32xf32>
      %39 = vector.broadcast %37 : vector<1x32xf32> to vector<8x32xf32>
      %40 = arith.subf %39, %38 : vector<8x32xf32>
      %c0_28 = arith.constant 0 : index
      %c0_29 = arith.constant 0 : index
      %41 = vector.load %arg7[%c0_28, %c0_29] : memref<32x128xf32, #tpu.memory_space<vmem>>, vector<32x128xf32>
      %cst_30 = arith.constant dense<0.000000e+00> : vector<8x128xf32>
      %42 = tpu.matmul %36, %41, %cst_30 {dimension_numbers = #tpu.dot_dimension_numbers<[1], [0], [0], [1], [0, 0, 1, 1], [], []>} : vector<8x32xf32>, vector<32x128xf32>, vector<8x128xf32> -> vector<8x128xf32>
      %43 = vector.extract_strided_slice %42 {offsets = [0, 0], sizes = [1, 128], strides = [1, 1]} : vector<8x128xf32> to vector<1x128xf32>
      %c0_31 = arith.constant 0 : index
      %c0_32 = arith.constant 0 : index
      %44 = vector.load %arg11[%c0_31, %c0_32] : memref<1x128xf32, #tpu.memory_space<vmem>>, vector<1x128xf32>
      tpu.vector_store %arg11[%c0_31, %c0_32], %43 {strides = array<i32>} : memref<1x128xf32, #tpu.memory_space<vmem>>, vector<1x128xf32>,
      %c0_33 = arith.constant 0 : index
      %c0_34 = arith.constant 0 : index
      %45 = vector.load %arg7[%c0_33, %c0_34] : memref<32x128xf32, #tpu.memory_space<vmem>>, vector<32x128xf32>
      %cst_35 = arith.constant dense<0.000000e+00> : vector<8x128xf32>
      %46 = tpu.matmul %40, %45, %cst_35 {dimension_numbers = #tpu.dot_dimension_numbers<[1], [0], [0], [1], [0, 0, 1, 1], [], []>} : vector<8x32xf32>, vector<32x128xf32>, vector<8x128xf32> -> vector<8x128xf32>
      %47 = vector.extract_strided_slice %46 {offsets = [0, 0], sizes = [1, 128], strides = [1, 1]} : vector<8x128xf32> to vector<1x128xf32>
      %c0_36 = arith.constant 0 : index
      %c0_37 = arith.constant 0 : index
      %48 = vector.load %arg12[%c0_36, %c0_37] : memref<1x128xf32, #tpu.memory_space<vmem>>, vector<1x128xf32>
      tpu.vector_store %arg12[%c0_36, %c0_37], %47 {strides = array<i32>} : memref<1x128xf32, #tpu.memory_space<vmem>>, vector<1x128xf32>,
    } else {
    }
    %c1_i32_9 = arith.constant 1 : i32
    %16 = arith.cmpi eq, %arg0, %c1_i32_9 : i32
    %17 = arith.extui %16 : i1 to i32
    %c0_i32_10 = arith.constant 0 : i32
    %18 = arith.cmpi ne, %17, %c0_i32_10 : i32
    scf.if %18 {
      %c0_11 = arith.constant 0 : index
      %c0_12 = arith.constant 0 : index
      %19 = vector.load %arg11[%c0_11, %c0_12] : memref<1x128xf32, #tpu.memory_space<vmem>>, vector<1x128xf32>
      %20 = vector.broadcast %19 : vector<1x128xf32> to vector<512x128xf32>
      %21 = arith.mulf %2, %20 : vector<512x128xf32>
      %c0_13 = arith.constant 0 : index
      %c0_14 = arith.constant 0 : index
      %22 = vector.load %arg12[%c0_13, %c0_14] : memref<1x128xf32, #tpu.memory_space<vmem>>, vector<1x128xf32>
      %23 = vector.broadcast %22 : vector<1x128xf32> to vector<512x128xf32>
      %24 = arith.addf %21, %23 : vector<512x128xf32>
      %cst_15 = arith.constant 0.000000e+00 : f32
      %25 = vector.broadcast %cst_15 : f32 to vector<512x128xf32>
      %26 = arith.subf %25, %24 : vector<512x128xf32>
      %27 = math.exp %26 : vector<512x128xf32>
      %cst_16 = arith.constant 1.000000e+00 : f32
      %28 = vector.broadcast %cst_16 : f32 to vector<512x128xf32>
      %29 = arith.addf %28, %27 : vector<512x128xf32>
      %cst_17 = arith.constant 1.000000e+00 : f32
      %30 = vector.broadcast %cst_17 : f32 to vector<512x128xf32>
      %31 = arith.divf %30, %29 : vector<512x128xf32>
      %32 = arith.mulf %24, %31 : vector<512x128xf32>
      %c0_18 = arith.constant 0 : index
      %c0_19 = arith.constant 0 : index
      %33 = vector.load %arg8[%c0_18, %c0_19] : memref<512x128xf32, #tpu.memory_space<vmem>>, vector<512x128xf32>
      tpu.vector_store %arg8[%c0_18, %c0_19], %32 {strides = array<i32>} : memref<512x128xf32, #tpu.memory_space<vmem>>, vector<512x128xf32>,
    } else {
    }
    return
  }
  func.func @transform_0(%arg0: i32, %arg1: i32) -> (i32, i32) {
    %c0_i32 = arith.constant 0 : i32
    %c0_i32_0 = arith.constant 0 : i32
    return %arg1, %c0_i32 : i32, i32
  }
  func.func @transform_1(%arg0: i32, %arg1: i32) -> (i32, i32) {
    %c0_i32 = arith.constant 0 : i32
    %c0_i32_0 = arith.constant 0 : i32
    %c0_i32_1 = arith.constant 0 : i32
    return %c0_i32, %c0_i32_0 : i32, i32
  }
  func.func @transform_2(%arg0: i32, %arg1: i32) -> (i32, i32) {
    %c0_i32 = arith.constant 0 : i32
    %c0_i32_0 = arith.constant 0 : i32
    %c0_i32_1 = arith.constant 0 : i32
    return %c0_i32, %c0_i32_0 : i32, i32
  }
  func.func @transform_3(%arg0: i32, %arg1: i32) -> (i32, i32) {
    %c0_i32 = arith.constant 0 : i32
    %c0_i32_0 = arith.constant 0 : i32
    %c0_i32_1 = arith.constant 0 : i32
    return %c0_i32, %c0_i32_0 : i32, i32
  }
  func.func @transform_4(%arg0: i32, %arg1: i32) -> (i32, i32) {
    %c0_i32 = arith.constant 0 : i32
    %c0_i32_0 = arith.constant 0 : i32
    %c0_i32_1 = arith.constant 0 : i32
    return %c0_i32, %c0_i32_0 : i32, i32
  }
  func.func @transform_5(%arg0: i32, %arg1: i32) -> (i32, i32) {
    %c0_i32 = arith.constant 0 : i32
    %c0_i32_0 = arith.constant 0 : i32
    %c0_i32_1 = arith.constant 0 : i32
    return %c0_i32, %c0_i32_0 : i32, i32
  }
  func.func @transform_6(%arg0: i32, %arg1: i32) -> (i32, i32) {
    %0 = arith.muli %arg0, %arg1 : i32
    %c0_i32 = arith.constant 0 : i32
    %c0_i32_0 = arith.constant 0 : i32
    return %0, %c0_i32 : i32, i32
  }
}

</mosaic_0001>

<bundles_post_ra>
// kernel: decoder_block_forward.1
= control target key start
LH: loop header
LB: loop body
LE: loop exit
PB: predicated region body
PF: predicated region fallthrough
CT: control target
= control target key end

     0   :  { %11 = vsyncpa [#allocation7], 0  ;;  %s4713_s0 = inlined_call_operand.vmem [shape: bf16[2048,32], index: 0, kind: input, shape index: {}]   ;;  %s4714_s1 = inlined_call_operand.vmem [shape: bf16[32,128], index: 1, kind: input, shape index: {}]   ;;  %s4715_s2 = inlined_call_operand.hbm [shape: f32[1,32], index: 2, kind: input, shape index: {}]   ;;  %s4716_s3 = inlined_call_operand.hbm [shape: f32[1,32], index: 3, kind: input, shape index: {}]   ;;  %s4717_s4 = inlined_call_operand.vmem [shape: f32[128,32], index: 4, kind: input, shape index: {}]   ;;  %s4718_s5 = inlined_call_operand.vmem [shape: f32[32,128], index: 5, kind: input, shape index: {}]   ;;  %s4719_s6 = inlined_call_operand.vmem [shape: f32[2048,128], index: 6, kind: output, shape index: {}]  }
   0x1   :  { %12 = vsyncpa [#allocation9], 0  ;;  %s3543_s21 = smov 0   ;;  %s3545_s22 = smov 0  }
   0x2   :  { %s3547_s23 = smov 0   ;;  %s3549_s24 = smov 0  }
   0x3   :  { %s3551_s25 = smov 0  }
   0x4 LB: > { %s2378_s26 = sadd.s32 4294967295, %s3499_s25   ;;  %s27_s27 = sadd.s32 1, %s3491_s23  ;;  %s3499_s25 = sphi %s3551_s25, %s18_s25   ;;  %s3495_s24 = sphi %s3549_s24, %s4865_s24   ;;  %s3491_s23 = sphi %s3547_s23, %s4864_s23   ;;  %s3487_s22 = sphi %s3545_s22, %s4863_s22   ;;  %s3483_s21 = sphi %s3543_s21, %s4862_s21  }
   0x5   : > { %p28_p0 = scmp.ge.s32.totalorder %s27_s27, 4  ;;  %s30_s28 = sadd.s32 1, %s3495_s24 }
   0x6   : > { %p2380_p1 = scmp.ge.s32.totalorder %s3499_s25, 1  ;;  %p194_p2 = scmp.lt.s32.totalorder %s3499_s25, 9 }
   0x7   : > { %s4867_s27 = smov (%p28_p0, %s27_s27), 0  ;;  %s4869_s28 = smov (!%p28_p0, %s30_s28), %s3495_s24 }
   0x8   : > { %p3576_p3 = pnand %p2380_p1, %p194_p2  ;;  %p32_p4 = scmp.ge.s32.totalorder %s4869_s28, 2 }
   0x9   : > { %p3580_p5 = scmp.eq.s32.totalorder %s2378_s26, 0  ;;  %s3501_s7 = smov [#allocation6]  }
   0xa   : > { %s4760_s29 = scalar_select %p3576_p3, 1, 0 }
   0xb   : > { %s4761_s30 = scalar_select %p3580_p5, 1, 0 }
   0xc   : > { %p3045_p6 = pneg %p3576_p3  ;;  %s4871_s28 = smov (%p32_p4, %s4869_s28), 0 }
   0xd   : > { %s210_s8 = sshll.u32 %s3501_s7, 4  ;;  %s3502_s10 = smov [#allocation8]   ;;  %s211_s8 = int_to_ptr.vmem [resolvable:$true] %s210_s8 }
   0xe   : > { %p3590_p7 = pnand %p3580_p5, %p3045_p6  ;;  %s221_s11 = sshll.u32 %s3502_s10, 4  ;;  %s222_s11 = int_to_ptr.vmem [resolvable:$true] %s221_s11 }
   0xf   : > { %s3397_s14 = scalar_lea.hbm %s4715_s2, 16 }
  0x10   : > { %p3398_p8 = scmp.ne.s32.totalorder %s4715_s2, %s3397_s14  ;;  %p3399_p9 = pneg %p3590_p7 }
  0x11   : > { %p3404_p12 = scmp.lt.u32.totalorder %s3397_s14, %s4715_s2 }
  0x12   : > { %p3400_p10 = pnand %p3399_p9, %p3398_p8 }
  0x14   : > { %p3401_p11 = pneg %p3400_p10 }
  0x16   : > { %p3406_p13 = pnand %p3404_p12, %p3401_p11 }
  0x18   : > { %3409 = shalt.err (!%p3406_p13)
}
  0x19   : > { %s3410_s19 = scalar_lea.vmem %s211_s8, 16  ;;  %s3417_s20 = scalar_lea.vmem %s211_s8, 32 }
  0x1a   : > { %p3411_p0 = scmp.ne.s32.totalorder %s211_s8, %s3410_s19  ;;  %p3418_p4 = scmp.lt.s32.totalorder %s211_s8, %s211_s8 }
  0x1b   : > { %p3419_p6 = scmp.lt.s32.totalorder %s3417_s20, %s3410_s19 }
  0x1c   : > { %p3413_p1 = pnand %p3411_p0, %p3399_p9 }
  0x1d   : > { %p3420_p5 = por %p3419_p6, %p3418_p4 }
  0x1e   : > { %p3414_p2 = pneg %p3413_p1 }
  0x20   : > { %p3421_p3 = pnand %p3420_p5, %p3414_p2 }
  0x22   : > { %3424 = shalt.err (!%p3421_p3)
}
  0x23   : > { %3048 = dma.hbm_to_vmem [thread:$0]  (!%p3590_p7), %s4715_s2, 16, %s211_s8, [#allocation7]  }
  0x24   : > { %s3425_s13 = scalar_lea.hbm %s4716_s3, 16 }
  0x25   : > { %p3426_p8 = scmp.ne.s32.totalorder %s4716_s3, %s3425_s13  ;;  %p3432_p10 = scmp.lt.u32.totalorder %s3425_s13, %s4716_s3 }
  0x27   : > { %p3428_p5 = pnand %p3426_p8, %p3399_p9 }
  0x29   : > { %p3429_p3 = pneg %p3428_p5 }
  0x2b   : > { %p3434_p11 = pnand %p3432_p10, %p3429_p3 }
  0x2d   : > { %3437 = shalt.err (!%p3434_p11)
}
  0x2e   : > { %s3438_s8 = scalar_lea.vmem %s222_s11, 16  ;;  %s3445_s18 = scalar_lea.vmem %s222_s11, 32 }
  0x2f   : > { %p3439_p12 = scmp.ne.s32.totalorder %s222_s11, %s3438_s8  ;;  %p3446_p1 = scmp.lt.s32.totalorder %s222_s11, %s222_s11 }
  0x30   : > { %p3447_p2 = scmp.lt.s32.totalorder %s3445_s18, %s3438_s8 }
  0x31   : > { %p3441_p13 = pnand %p3439_p12, %p3399_p9 }
  0x32   : > { %p3448_p4 = por %p3447_p2, %p3446_p1 }
  0x33   : > { %p3442_p0 = pneg %p3441_p13 }
  0x35   : > { %p3449_p6 = pnand %p3448_p4, %p3442_p0 }
  0x37   : > { %3452 = shalt.err (!%p3449_p6)
}
  0x38   : > { %3051 = dma.hbm_to_vmem [thread:$0]  (!%p3590_p7), %s4716_s3, 16, %s222_s11, [#allocation9]  }
  0x39   : > { %p4763_p8 = scmp.ne.s32.totalorder %s4760_s29, 0 }
  0x3b   : > { %249 = sbr.rel (%p4763_p8) target bundleno = 1281 (0x501), region = 44 }
  0x42   : > { %p4764_p5 = scmp.ne.s32.totalorder %s4761_s30, 0 }
  0x44   : > { %3474 = dma.done.wait (%p4764_p5), [#allocation7], 16  }
  0x45   : > { %3476 = vsyncadd (%p4764_p5), [#allocation7], 4294967280 }
  0x46   : > { %3478 = dma.done.wait (%p4764_p5), [#allocation9], 16  }
  0x47   : > { %3480 = vsyncadd (%p4764_p5), [#allocation9], 4294967280  ;;  %s290_s9 = smul.u32 %s3483_s21, %s3487_s22  ;;  %s2387_s11 = sshll.u32 %s3483_s21, 6  ;;  %v3103_v0 = vld [vmem:[%s4714_s1] sm:$0xff]   ;;  %v3104_v1 = vld [vmem:[%s4714_s1 + $0x8] sm:$0xff]   ;;  %vm539_vm0 = vcmask 261120  }
  0x48   : > { %p285_p7 = scmp.lt.s32.totalorder %s2387_s11, 255  ;;  %2685 = vmatprep.subr.bf16.mxu0 %v3103_v0  ;;  %3033 = vmatprep.subr.bf16.mxu1 %v3103_v0  ;;  %p925_p3 = scmp.eq.s32.totalorder %s3487_s22, 0 }
  0x49   : > { %s2389_s29 = sshll.u32 %s290_s9, 6  ;;  %2686 = vmatpush3.bf16.msra.mxu0 %v3103_v0  ;;  %3035 = vmatpush3.bf16.msra.mxu1 %v3103_v0  ;;  %p926_p10 = scmp.eq.s32.totalorder %s3483_s21, 0 }
  0x4a   : > { %p292_p9 = scmp.lt.s32.totalorder %s2389_s29, 255  ;;  %s4873_s11 = smov (!%p285_p7, %s2387_s11), 255  ;;  %2687 = vmatprep.subr.bf16.mxu0 %v3104_v1  ;;  %3034 = vmatprep.subr.bf16.mxu1 %v3104_v1 }
  0x4b   : > { %s2388_s26 = sshll.u32 %s4873_s11, 2  ;;  %p3733_p11 = pnand %p926_p10, %p925_p3 }
  0x4c   : > { %s4875_s29 = smov (!%p292_p9, %s2389_s29), 255  ;;  %s3655_s30 = scalar_lea.vmem %s4713_s0, %s2388_s26 }
  0x4d   : > { %s2390_s7 = sshll.u32 %s4875_s29, 3  ;;  %v3105_v2 = vld [vmem:[%s3655_s30] sm:$0xff]   ;;  %v3107_v4 = vld [vmem:[%s3655_s30 + $0x8] sm:$0xff]   ;;  %v3109_v6 = vld [vmem:[%s3655_s30 + $0x10] sm:$0xff]   ;;  %2688 = vmatpush3.bf16.msra.mxu0 %v3104_v1  ;;  %3036 = vmatpush3.bf16.msra.mxu1 %v3104_v1 }
  0x4e   : > { %s3660_s17 = scalar_lea.vmem %s4719_s6, %s2390_s7  ;;  %v3106_v3 = vld [vmem:[%s3655_s30 + $0x80] sm:$0xff]   ;;  %2689 = vmatprep.mubr.msk.bf16.mxu0 %vm539_vm0, %v3105_v2  ;;  %v3108_v5 = vld [vmem:[%s3655_s30 + $0x88] sm:$0xff]   ;;  %v3110_v7 = vld [vmem:[%s3655_s30 + $0x90] sm:$0xff]  }
  0x4f   : > { %2721 = vmatprep.mubr.msk.bf16.mxu1 %vm539_vm0, %v3106_v3  ;;  %v3111_v8 = vld [vmem:[%s3655_s30 + $0x18] sm:$0xff]   ;;  %v3113_v10 = vld [vmem:[%s3655_s30 + $0x20] sm:$0xff]   ;;  %v3115_v12 = vld [vmem:[%s3655_s30 + $0x28] sm:$0xff]  }
  0x50   : > { %2690 = vmatmul.mubr.msk.bf16.vlgmr.msra.gmra.mrb[0].mxu0 %vm539_vm0, %v3107_v4  ;;  %2722 = vmatmul.mubr.msk.bf16.vlgmr.msra.gmra.mrb[0].mxu1 %vm539_vm0, %v3108_v5  ;;  %v3112_v9 = vld [vmem:[%s3655_s30 + $0x98] sm:$0xff]   ;;  %v3114_v11 = vld [vmem:[%s3655_s30 + $0xa0] sm:$0xff]   ;;  %v3116_v13 = vld [vmem:[%s3655_s30 + $0xa8] sm:$0xff]  }
  0x51   : > { %2693 = vmatprep.mubr.msk.bf16.mxu0 %vm539_vm0, %v3109_v6  ;;  %2725 = vmatprep.mubr.msk.bf16.mxu1 %vm539_vm0, %v3110_v7  ;;  %v3117_v14 = vld [vmem:[%s3655_s30 + $0x30] sm:$0xff]   ;;  %v3119_v16 = vld [vmem:[%s3655_s30 + $0x38] sm:$0xff]   ;;  %v3121_v18 = vld [vmem:[%s3655_s30 + $0x40] sm:$0xff]  }
  0x52   : > { %v3118_v15 = vld [vmem:[%s3655_s30 + $0xb0] sm:$0xff]   ;;  %v3120_v17 = vld [vmem:[%s3655_s30 + $0xb8] sm:$0xff]   ;;  %v3122_v19 = vld [vmem:[%s3655_s30 + $0xc0] sm:$0xff]  }
  0x53   : > { %v3123_v20 = vld [vmem:[%s3655_s30 + $0x48] sm:$0xff]   ;;  %v3125_v22 = vld [vmem:[%s3655_s30 + $0x50] sm:$0xff]   ;;  %v3127_v24 = vld [vmem:[%s3655_s30 + $0x58] sm:$0xff]  }
  0x54   : > { %v3124_v21 = vld [vmem:[%s3655_s30 + $0xc8] sm:$0xff]   ;;  %v3126_v23 = vld [vmem:[%s3655_s30 + $0xd0] sm:$0xff]   ;;  %v3128_v25 = vld [vmem:[%s3655_s30 + $0xd8] sm:$0xff]  }
  0x55   : > { %v3129_v26 = vld [vmem:[%s3655_s30 + $0x60] sm:$0xff]   ;;  %v3131_v28 = vld [vmem:[%s3655_s30 + $0x68] sm:$0xff]   ;;  %v3133_v30 = vld [vmem:[%s3655_s30 + $0x70] sm:$0xff]  }
  0x56   : > { %v3130_v27 = vld [vmem:[%s3655_s30 + $0xe0] sm:$0xff]   ;;  %v3132_v29 = vld [vmem:[%s3655_s30 + $0xe8] sm:$0xff]   ;;  %v3134_v31 = vld [vmem:[%s3655_s30 + $0xf0] sm:$0xff]  }
  0x57   : > { %v3135_v32 = vld [vmem:[%s3655_s30 + $0x78] sm:$0xff]  }
  0x58   : > { %2694 = vmatmul.mubr.msk.bf16.gmra.mrb[4].mxu0 %vm539_vm0, %v3111_v8  ;;  %2726 = vmatmul.mubr.msk.bf16.gmra.mrb[4].mxu1 %vm539_vm0, %v3112_v9  ;;  %v3136_v33 = vld [vmem:[%s3655_s30 + $0xf8] sm:$0xff]  }
  0x59   : > { %2697 = vmatprep.mubr.msk.bf16.mxu0 %vm539_vm0, %v3113_v10  ;;  %2729 = vmatprep.mubr.msk.bf16.mxu1 %vm539_vm0, %v3114_v11 }
  0x60   : > { %2698 = vmatmul.mubr.msk.bf16.gmra.mrb[8].mxu0 %vm539_vm0, %v3115_v12  ;;  %2730 = vmatmul.mubr.msk.bf16.gmra.mrb[8].mxu1 %vm539_vm0, %v3116_v13 }
  0x61   : > { %2701 = vmatprep.mubr.msk.bf16.mxu0 %vm539_vm0, %v3117_v14  ;;  %2733 = vmatprep.mubr.msk.bf16.mxu1 %vm539_vm0, %v3118_v15 }
  0x68   : > { %2702 = vmatmul.mubr.msk.bf16.gmra.mrb[12].mxu0 %vm539_vm0, %v3119_v16  ;;  %2734 = vmatmul.mubr.msk.bf16.gmra.mrb[12].mxu1 %vm539_vm0, %v3120_v17 }
  0x69   : > { %2705 = vmatprep.mubr.msk.bf16.mxu0 %vm539_vm0, %v3121_v18  ;;  %2737 = vmatprep.mubr.msk.bf16.mxu1 %vm539_vm0, %v3122_v19 }
  0x70   : > { %2706 = vmatmul.mubr.msk.bf16.gmra.mrb[16].mxu0 %vm539_vm0, %v3123_v20  ;;  %2738 = vmatmul.mubr.msk.bf16.gmra.mrb[16].mxu1 %vm539_vm0, %v3124_v21 }
  0x71   : > { %2709 = vmatprep.mubr.msk.bf16.mxu0 %vm539_vm0, %v3125_v22  ;;  %2741 = vmatprep.mubr.msk.bf16.mxu1 %vm539_vm0, %v3126_v23 }
  0x78   : > { %2710 = vmatmul.mubr.msk.bf16.gmra.mrb[20].mxu0 %vm539_vm0, %v3127_v24  ;;  %2742 = vmatmul.mubr.msk.bf16.gmra.mrb[20].mxu1 %vm539_vm0, %v3128_v25 }
  0x79   : > { %2713 = vmatprep.mubr.msk.bf16.mxu0 %vm539_vm0, %v3129_v26  ;;  %2745 = vmatprep.mubr.msk.bf16.mxu1 %vm539_vm0, %v3130_v27 }
  0x80   : > { %2714 = vmatmul.mubr.msk.bf16.gmra.mrb[24].mxu0 %vm539_vm0, %v3131_v28  ;;  %2746 = vmatmul.mubr.msk.bf16.gmra.mrb[24].mxu1 %vm539_vm0, %v3132_v29 }
  0x81   : > { %2717 = vmatprep.mubr.msk.bf16.mxu0 %vm539_vm0, %v3133_v30  ;;  %2749 = vmatprep.mubr.msk.bf16.mxu1 %vm539_vm0, %v3134_v31 }
  0x88   : > { %2718 = vmatmul.mubr.msk.bf16.gmra.mrb[28].mxu0 %vm539_vm0, %v3135_v32  ;;  %2750 = vmatmul.mubr.msk.bf16.gmra.mrb[28].mxu1 %vm539_vm0, %v3136_v33 }
 0x123   : > { %v3737_v34 = vpop.f32.mrb[0].mxu0  ;;  %v3739_v35 = vpop.f32.mrb[0].mxu1 }
 0x124   : > { %v3741_v36 = vpop.f32.mrb[1].mxu0  ;;  %v3743_v37 = vpop.f32.mrb[1].mxu1 }
 0x125   : > { %4766 = vst [vmem:[#allocation12_spill] sm:$0xff] %v3741_v36  ;;  %4767 = vst [vmem:[#allocation13_spill] sm:$0xff] %v3743_v37  ;;  %v3745_v38 = vpop.f32.mrb[2].mxu0  ;;  %v3747_v39 = vpop.f32.mrb[2].mxu1 }
 0x126   : > { %v3749_v40 = vpop.f32.mrb[3].mxu0  ;;  %v3751_v41 = vpop.f32.mrb[3].mxu1 }
 0x127   : > { %4768 = vst [vmem:[#allocation14_spill] sm:$0xff] %v3749_v40  ;;  %4769 = vst [vmem:[#allocation15_spill] sm:$0xff] %v3751_v41 }
 0x12b   : > { %v3753_v42 = vpop.f32.mrb[4].mxu0  ;;  %v3755_v43 = vpop.f32.mrb[4].mxu1 }
 0x12c   : > { %v3757_v44 = vpop.f32.mrb[5].mxu0  ;;  %v3759_v45 = vpop.f32.mrb[5].mxu1 }
 0x12d   : > { %v3761_v46 = vpop.f32.mrb[6].mxu0  ;;  %v3763_v47 = vpop.f32.mrb[6].mxu1 }
 0x12e   : > { %v3765_v48 = vpop.f32.mrb[7].mxu0  ;;  %v3767_v49 = vpop.f32.mrb[7].mxu1 }
 0x133   : > { %v3769_v50 = vpop.f32.mrb[8].mxu0  ;;  %v3771_v51 = vpop.f32.mrb[8].mxu1 }
 0x134   : > { %v3773_v52 = vpop.f32.mrb[9].mxu0  ;;  %v3775_v53 = vpop.f32.mrb[9].mxu1 }
 0x135   : > { %v3777_v54 = vpop.f32.mrb[10].mxu0  ;;  %v3779_v55 = vpop.f32.mrb[10].mxu1 }
 0x136   : > { %v3781_v56 = vpop.f32.mrb[11].mxu0  ;;  %v3783_v57 = vpop.f32.mrb[11].mxu1 }
 0x13b   : > { %v3785_v58 = vpop.f32.mrb[12].mxu0  ;;  %v3787_v59 = vpop.f32.mrb[12].mxu1 }
 0x13c   : > { %4770 = vst [vmem:[#allocation16_spill] sm:$0xff] %v3785_v58  ;;  %4771 = vst [vmem:[#allocation17_spill] sm:$0xff] %v3787_v59  ;;  %v3789_v60 = vpop.f32.mrb[13].mxu0  ;;  %v3791_v61 = vpop.f32.mrb[13].mxu1 }
 0x13d   : > { %4772 = vst [vmem:[#allocation18_spill] sm:$0xff] %v3789_v60  ;;  %4773 = vst [vmem:[#allocation19_spill] sm:$0xff] %v3791_v61  ;;  %v3793_v62 = vpop.f32.mrb[14].mxu0  ;;  %v3795_v63 = vpop.f32.mrb[14].mxu1 }
 0x13e   : > { %4774 = vst [vmem:[#allocation20_spill] sm:$0xff] %v3793_v62  ;;  %4775 = vst [vmem:[#allocation21_spill] sm:$0xff] %v3795_v63  ;;  %v3797_v0 = vpop.f32.mrb[15].mxu0  ;;  %v3799_v1 = vpop.f32.mrb[15].mxu1  ;;  %v3503_v63 = vmov (!%p3733_p11), 0.0  }
 0x13f   : > { %4776 = vst [vmem:[#allocation22_spill] sm:$0xff] %v3797_v0  ;;  %4777 = vst [vmem:[#allocation23_spill] sm:$0xff] %v3799_v1 }
 0x140   : > { %931 = vst [vmem:[#allocation2] sm:$0xff] (!%p3733_p11), %v3503_v63  ;;  %932 = vst [vmem:[#allocation3] sm:$0xff] (!%p3733_p11), %v3503_v63 }
 0x143   : > { %v3801_v2 = vpop.f32.mrb[16].mxu0  ;;  %v3803_v3 = vpop.f32.mrb[16].mxu1 }
 0x144   : > { %4778 = vst [vmem:[#allocation24_spill] sm:$0xff] %v3801_v2  ;;  %4779 = vst [vmem:[#allocation25_spill] sm:$0xff] %v3803_v3  ;;  %v3805_v4 = vpop.f32.mrb[17].mxu0  ;;  %v3807_v5 = vpop.f32.mrb[17].mxu1 }
 0x145   : > { %4780 = vst [vmem:[#allocation26_spill] sm:$0xff] %v3805_v4  ;;  %4781 = vst [vmem:[#allocation27_spill] sm:$0xff] %v3807_v5  ;;  %v3809_v6 = vpop.f32.mrb[18].mxu0  ;;  %v3811_v7 = vpop.f32.mrb[18].mxu1 }
 0x146   : > { %4782 = vst [vmem:[#allocation28_spill] sm:$0xff] %v3809_v6  ;;  %4783 = vst [vmem:[#allocation29_spill] sm:$0xff] %v3811_v7  ;;  %v3813_v8 = vpop.f32.mrb[19].mxu0  ;;  %v3815_v9 = vpop.f32.mrb[19].mxu1 }
 0x147   : > { %4784 = vst [vmem:[#allocation30_spill] sm:$0xff] %v3813_v8  ;;  %4785 = vst [vmem:[#allocation31_spill] sm:$0xff] %v3815_v9 }
 0x14b   : > { %v3817_v10 = vpop.f32.mrb[20].mxu0  ;;  %v3819_v11 = vpop.f32.mrb[20].mxu1 }
 0x14c   : > { %4786 = vst [vmem:[#allocation32_spill] sm:$0xff] %v3819_v11  ;;  %v3821_v12 = vpop.f32.mrb[21].mxu0  ;;  %v3823_v13 = vpop.f32.mrb[21].mxu1 }
 0x14d   : > { %4787 = vst [vmem:[#allocation33_spill] sm:$0xff] %v3823_v13  ;;  %v3825_v14 = vpop.f32.mrb[22].mxu0  ;;  %v3827_v15 = vpop.f32.mrb[22].mxu1 }
 0x14e   : > { %4788 = vst [vmem:[#allocation34_spill] sm:$0xff] %v3827_v15  ;;  %v3829_v16 = vpop.f32.mrb[23].mxu0  ;;  %v3831_v17 = vpop.f32.mrb[23].mxu1 }
 0x14f   : > { %4789 = vst [vmem:[#allocation35_spill] sm:$0xff] %v3831_v17 }
 0x153   : > { %v3833_v18 = vpop.f32.mrb[24].mxu0  ;;  %v3835_v19 = vpop.f32.mrb[24].mxu1 }
 0x154   : > { %4790 = vst [vmem:[#allocation36_spill] sm:$0xff] %v3835_v19  ;;  %v3837_v20 = vpop.f32.mrb[25].mxu0  ;;  %v3839_v21 = vpop.f32.mrb[25].mxu1 }
 0x155   : > { %4791 = vst [vmem:[#allocation37_spill] sm:$0xff] %v3839_v21  ;;  %v3841_v22 = vpop.f32.mrb[26].mxu0  ;;  %v3843_v23 = vpop.f32.mrb[26].mxu1 }
 0x156   : > { %4792 = vst [vmem:[#allocation38_spill] sm:$0xff] %v3843_v23  ;;  %v3845_v24 = vpop.f32.mrb[27].mxu0  ;;  %v3847_v25 = vpop.f32.mrb[27].mxu1 }
 0x157   : > { %4793 = vst [vmem:[#allocation39_spill] sm:$0xff] %v3847_v25 }
 0x159   : > { %930 = sbr.rel (%p3733_p11) target bundleno = 352 (0x160), region = 56 }
 0x15b   : > { %v3849_v26 = vpop.f32.mrb[28].mxu0  ;;  %v3851_v27 = vpop.f32.mrb[28].mxu1 }
 0x15c   : > { %4794 = vst [vmem:[#allocation40_spill] sm:$0xff] %v3849_v26  ;;  %4795 = vst [vmem:[#allocation41_spill] sm:$0xff] %v3851_v27  ;;  %v3853_v28 = vpop.f32.mrb[29].mxu0  ;;  %v3855_v29 = vpop.f32.mrb[29].mxu1 }
 0x15d   : > { %4796 = vst [vmem:[#allocation42_spill] sm:$0xff] %v3855_v29  ;;  %v3857_v30 = vpop.f32.mrb[30].mxu0  ;;  %v3859_v31 = vpop.f32.mrb[30].mxu1 }
 0x15e   : > { %4797 = vst [vmem:[#allocation43_spill] sm:$0xff] %v3857_v30  ;;  %4798 = vst [vmem:[#allocation44_spill] sm:$0xff] %v3859_v31  ;;  %v3861_v32 = vpop.f32.mrb[31].mxu0  ;;  %v3863_v33 = vpop.f32.mrb[31].mxu1 }
 0x15f   : > { %4799 = vst [vmem:[#allocation45_spill] sm:$0xff] %v3861_v32  ;;  %4800 = vst [vmem:[#allocation46_spill] sm:$0xff] %v3863_v33 }
 0x160 PF: > { %p2457_p12 = scmp.ne.s32.totalorder %s3487_s22, 0 }
 0x161   : > { %v2845_v59 = vpack.c.bf16 (!%p2457_p12), %v3813_v8, %v3805_v4  ;;  %v2877_v62 = vpack.c.bf16 (!%p2457_p12), %v3815_v9, %v3807_v5  ;;  %v2847_v58 = vpack.c.bf16 (!%p2457_p12), %v3749_v40, %v3741_v36  ;;  %v2879_v31 = vpack.c.bf16 (!%p2457_p12), %v3751_v41, %v3743_v37 }
 0x162   : > { %935 = sbr.rel (%p2457_p12) target bundleno = 639 (0x27f), region = 60  ;;  %v2849_v27 = vpack.c.bf16 (!%p2457_p12), %v3809_v6, %v3801_v2  ;;  %v2881_v63 = vpack.c.bf16 (!%p2457_p12), %v3811_v7, %v3803_v3  ;;  %v2851_v8 = vpack.c.bf16 (!%p2457_p12), %v3745_v38, %v3737_v34  ;;  %v2883_v9 = vpack.c.bf16 (!%p2457_p12), %v3747_v39, %v3739_v35 }
 0x163   : > { %2846 = vmatprep.subr.bf16.mxu0 (!%p2457_p12), %v2845_v59  ;;  %2878 = vmatprep.subr.bf16.mxu1 (!%p2457_p12), %v2877_v62  ;;  %v2853_v41 = vpack.c.bf16 (!%p2457_p12), %v3829_v16, %v3821_v12  ;;  %v2885_v6 = vpack.c.bf16 (!%p2457_p12), %v3831_v17, %v3823_v13  ;;  %v4734_v2 = vmov (!%p2457_p12), 1.0   ;;  %v2887_v59 = vpack.c.bf16 (!%p2457_p12), %v3767_v49, %v3759_v45 }
 0x164   : > { %2848 = vmatpush3.bf16.msra.mxu0 (!%p2457_p12), %v2847_v58  ;;  %2880 = vmatpush3.bf16.msra.mxu1 (!%p2457_p12), %v2879_v31  ;;  %v2855_v58 = vpack.c.bf16 (!%p2457_p12), %v3765_v48, %v3757_v44  ;;  %v2857_v62 = vpack.c.bf16 (!%p2457_p12), %v3825_v14, %v3817_v10  ;;  %v2863_v31 = vpack.c.bf16 (!%p2457_p12), %v3781_v56, %v3773_v52 }
 0x165   : > { %2850 = vmatprep.subr.bf16.mxu0 (!%p2457_p12), %v2849_v27  ;;  %2882 = vmatprep.subr.bf16.mxu1 (!%p2457_p12), %v2881_v63  ;;  %v2889_v27 = vpack.c.bf16 (!%p2457_p12), %v3827_v15, %v3819_v11  ;;  %v2895_v63 = vpack.c.bf16 (!%p2457_p12), %v3783_v57, %v3775_v53 }
 0x166   : > { %1001 = vmatprep.mubr.f32.mxu0 (!%p2457_p12), %v4734_v2  ;;  %1071 = vmatprep.mubr.f32.mxu1 (!%p2457_p12), %v4734_v2  ;;  %v4802_v2 = vld [vmem:[#allocation41_spill] sm:$0xff] (!%p2457_p12) }
 0x168   : > { %2852 = vmatpush3.bf16.msra.mxu0 (!%p2457_p12), %v2851_v8  ;;  %2884 = vmatpush3.bf16.msra.mxu1 (!%p2457_p12), %v2883_v9  ;;  %v2859_v8 = vpack.c.bf16 (!%p2457_p12), %v3761_v46, %v3753_v42  ;;  %v2891_v9 = vpack.c.bf16 (!%p2457_p12), %v3763_v47, %v3755_v43 }
 0x169   : > { %2854 = vmatprep.subr.bf16.mxu0 %v2853_v41  ;;  %2886 = vmatprep.subr.bf16.mxu1 %v2885_v6  ;;  %v2861_v41 = vpack.c.bf16 %v3845_v24, %v3837_v20  ;;  %v2893_v6 = vpack.c.bf16 %v3847_v25, %v3839_v21 }
 0x16c   : > { %2856 = vmatpush3.bf16.msra.mxu0 %v2855_v58  ;;  %2888 = vmatpush3.bf16.msra.mxu1 %v2887_v59  ;;  %v2865_v58 = vpack.c.bf16 %v3841_v22, %v3833_v18  ;;  %v2897_v59 = vpack.c.bf16 %v3843_v23, %v3835_v19 }
 0x16d   : > { %2858 = vmatprep.subr.bf16.mxu0 %v2857_v62  ;;  %2890 = vmatprep.subr.bf16.mxu1 %v2889_v27  ;;  %v2867_v62 = vpack.c.bf16 %v3777_v54, %v3769_v50  ;;  %v2899_v27 = vpack.c.bf16 %v3779_v55, %v3771_v51 }
 0x170   : > { %2860 = vmatpush3.bf16.msra.mxu0 %v2859_v8  ;;  %2892 = vmatpush3.bf16.msra.mxu1 %v2891_v9  ;;  %v2869_v8 = vpack.c.bf16 %v3861_v32, %v3853_v28  ;;  %v2901_v9 = vpack.c.bf16 %v3863_v33, %v3855_v29  ;;  %v4803_v33 = vld [vmem:[#allocation44_spill] sm:$0xff] }
 0x171   : > { %2862 = vmatprep.subr.bf16.mxu0 %v2861_v41  ;;  %2894 = vmatprep.subr.bf16.mxu1 %v2893_v6  ;;  %v2871_v41 = vpack.c.bf16 %v3797_v0, %v3789_v60  ;;  %v2903_v6 = vpack.c.bf16 %v3799_v1, %v3791_v61  ;;  %v2905_v29 = vpack.c.bf16 %v4803_v33, %v4802_v2  ;;  %v4804_v1 = vld [vmem:[#allocation31_spill] sm:$0xff]  ;;  %v4807_v33 = vld [vmem:[#allocation20_spill] sm:$0xff] }
 0x172   : > { %v1128_v0 = vmul.f32 %v3807_v5, %v3807_v5  ;;  %v4809_v5 = vld [vmem:[#allocation21_spill] sm:$0xff]  ;;  %v4810_v60 = vld [vmem:[#allocation24_spill] sm:$0xff] }
 0x173   : > { %v4811_v32 = vld [vmem:[#allocation28_spill] sm:$0xff] }
 0x174   : > { %2864 = vmatpush3.bf16.msra.mxu0 %v2863_v31  ;;  %2896 = vmatpush3.bf16.msra.mxu1 %v2895_v63  ;;  %v2873_v31 = vpack.c.bf16 %v3857_v30, %v3849_v26  ;;  %v1096_v63 = vmul.f32 %v3805_v4, %v3805_v4  ;;  %v1081_v4 = vmul.f32 %v3749_v40, %v3749_v40  ;;  %v4806_v30 = vld [vmem:[#allocation16_spill] sm:$0xff]  ;;  %v4808_v26 = vld [vmem:[#allocation17_spill] sm:$0xff] }
 0x175   : > { %2866 = vmatprep.subr.bf16.mxu0 %v2865_v58  ;;  %2898 = vmatprep.subr.bf16.mxu1 %v2897_v59  ;;  %v4801_v58 = vld [vmem:[#allocation30_spill] sm:$0xff]  ;;  %v2875_v2 = vpack.c.bf16 %v4807_v33, %v4806_v30  ;;  %v2907_v61 = vpack.c.bf16 %v4809_v5, %v4808_v26  ;;  %v1099_v40 = vmul.f32 %v4811_v32, %v4811_v32 }
 0x176   : > { %v1097_v59 = vmul.f32 %v4801_v58, %v4801_v58  ;;  %v1112_v58 = vmul.f32 %v3743_v37, %v3743_v37  ;;  %v1131_v33 = vmul.f32 %v3811_v7, %v3811_v7  ;;  %v1114_v32 = vmul.f32 %v3739_v35, %v3739_v35 }
 0x178   : > { %2868 = vmatpush3.bf16.msra.mxu0 %v2867_v62  ;;  %2900 = vmatpush3.bf16.msra.mxu1 %v2899_v27  ;;  %v1129_v62 = vmul.f32 %v4804_v1, %v4804_v1  ;;  %v1080_v27 = vmul.f32 %v3741_v36, %v3741_v36  ;;  %v2909_v1 = vpack.c.bf16 %v1097_v59, %v1096_v63 }
 0x179   : > { %2870 = vmatprep.subr.bf16.mxu0 %v2869_v8  ;;  %2902 = vmatprep.subr.bf16.mxu1 %v2901_v9  ;;  %v4805_v8 = vld [vmem:[#allocation15_spill] sm:$0xff]  ;;  %v1098_v36 = vmul.f32 %v4810_v60, %v4810_v60  ;;  %v1083_v60 = vmul.f32 %v3745_v38, %v3745_v38  ;;  %v1132_v63 = vmul.f32 %v3823_v13, %v3823_v13 }
 0x17a   : > { %v1113_v9 = vmul.f32 %v4805_v8, %v4805_v8  ;;  %v2941_v37 = vpack.c.bf16 %v1129_v62, %v1128_v0  ;;  %v1130_v8 = vmul.f32 %v3803_v3, %v3803_v3  ;;  %v2911_v30 = vpack.c.bf16 %v1081_v4, %v1080_v27 }
 0x17b   : > { %v1115_v0 = vmul.f32 %v3747_v39, %v3747_v39  ;;  %v1101_v4 = vmul.f32 %v3829_v16, %v3829_v16  ;;  %v1133_v59 = vmul.f32 %v3831_v17, %v3831_v17  ;;  %v1135_v17 = vmul.f32 %v3827_v15, %v3827_v15  ;;  %v4819_v15 = vld [vmem:[#allocation23_spill] sm:$0xff] }
 0x17c   : > { %2872 = vmatpush3.bf16.msra.mxu0 %v2871_v41  ;;  %2904 = vmatpush3.bf16.msra.mxu1 %v2903_v6  ;;  %v2943_v5 = vpack.c.bf16 %v1113_v9, %v1112_v58  ;;  %v1082_v41 = vmul.f32 %v3737_v34, %v3737_v34  ;;  %v1100_v6 = vmul.f32 %v3821_v12, %v3821_v12 }
 0x17d   : > { %2874 = vmatprep.subr.bf16.mxu0 %v2873_v31  ;;  %2906 = vmatprep.subr.bf16.mxu1 %v2905_v29  ;;  %v2913_v29 = vpack.c.bf16 %v1099_v40, %v1098_v36  ;;  %v2945_v31 = vpack.c.bf16 %v1131_v33, %v1130_v8  ;;  %v1085_v36 = vmul.f32 %v3765_v48, %v3765_v48 }
 0x17e   : > { %v1116_v40 = vmul.f32 %v3759_v45, %v3759_v45  ;;  %v2915_v33 = vpack.c.bf16 %v1083_v60, %v1082_v41  ;;  %v2947_v62 = vpack.c.bf16 %v1115_v0, %v1114_v32  ;;  %v2917_v27 = vpack.c.bf16 %v1101_v4, %v1100_v6 }
 0x17f   : > { %v1102_v58 = vmul.f32 %v3817_v10, %v3817_v10  ;;  %v1103_v9 = vmul.f32 %v3825_v14, %v3825_v14  ;;  %v1134_v8 = vmul.f32 %v3819_v11, %v3819_v11  ;;  %v1118_v32 = vmul.f32 %v3755_v43, %v3755_v43 }
 0x180   : > { %2876 = vmatpush3.bf16.msra.mxu0 %v2875_v2  ;;  %2908 = vmatpush3.bf16.msra.mxu1 %v2907_v61  ;;  %v1084_v2 = vmul.f32 %v3757_v44, %v3757_v44  ;;  %v1117_v61 = vmul.f32 %v3767_v49, %v3767_v49  ;;  %v1119_v0 = vmul.f32 %v3763_v47, %v3763_v47 }
 0x181   : > { %2910 = vmatprep.subr.bf16.mxu0 %v2909_v1  ;;  %2942 = vmatprep.subr.bf16.mxu1 %v2941_v37  ;;  %v4812_v37 = vmov 1.0   ;;  %v2949_v1 = vpack.c.bf16 %v1133_v59, %v1132_v63  ;;  %v1105_v6 = vmul.f32 %v3845_v24, %v3845_v24  ;;  %v1136_v4 = vmul.f32 %v3839_v21, %v3839_v21  ;;  %v4818_v21 = vld [vmem:[#allocation19_spill] sm:$0xff] }
 0x182   : > { %v2919_v41 = vpack.c.bf16 %v1085_v36, %v1084_v2  ;;  %v2951_v60 = vpack.c.bf16 %v1117_v61, %v1116_v40  ;;  %v2921_v63 = vpack.c.bf16 %v1103_v9, %v1102_v58  ;;  %v2953_v59 = vpack.c.bf16 %v1135_v17, %v1134_v8 }
 0x183   : > { %1002 = vmatmul.mubr.f32.vlgmr.msra.gmra.mrb[0].mxu0 %v4812_v37  ;;  %1072 = vmatmul.mubr.f32.vlgmr.msra.gmra.mrb[0].mxu1 %v4812_v37  ;;  %v1088_v2 = vmul.f32 %v3773_v52, %v3773_v52  ;;  %v1089_v36 = vmul.f32 %v3781_v56, %v3781_v56  ;;  %v2955_v61 = vpack.c.bf16 %v1119_v0, %v1118_v32 }
 0x184   : > { %2912 = vmatpush3.bf16.msra.mxu0 %v2911_v30  ;;  %2944 = vmatpush3.bf16.msra.mxu1 %v2943_v5  ;;  %v1086_v5 = vmul.f32 %v3753_v42, %v3753_v42  ;;  %v1087_v30 = vmul.f32 %v3761_v46, %v3761_v46  ;;  %v1106_v17 = vmul.f32 %v3833_v18, %v3833_v18 }
 0x185   : > { %2914 = vmatprep.subr.bf16.mxu0 %v2913_v29  ;;  %2946 = vmatprep.subr.bf16.mxu1 %v2945_v31  ;;  %v1104_v29 = vmul.f32 %v3837_v20, %v3837_v20  ;;  %v1137_v31 = vmul.f32 %v3847_v25, %v3847_v25  ;;  %v1107_v58 = vmul.f32 %v3841_v22, %v3841_v22 }
 0x186   : > { %1208 = vmatprep.mubr.f32.mxu0 %v4812_v37  ;;  %1278 = vmatprep.mubr.f32.mxu1 %v4812_v37  ;;  %v2923_v40 = vpack.c.bf16 %v1087_v30, %v1086_v5  ;;  %v1138_v9 = vmul.f32 %v3835_v19, %v3835_v19  ;;  %v1139_v8 = vmul.f32 %v3843_v23, %v3843_v23  ;;  %v4816_v23 = vld [vmem:[#allocation18_spill] sm:$0xff] }
 0x187   : > { %v2927_v5 = vpack.c.bf16 %v1089_v36, %v1088_v2  ;;  %v1122_v32 = vmul.f32 %v3771_v51, %v3771_v51  ;;  %v1123_v0 = vmul.f32 %v3779_v55, %v3779_v55  ;;  %v2929_v36 = vpack.c.bf16 %v1107_v58, %v1106_v17  ;;  %v4820_v17 = vld [vmem:[#allocation40_spill] sm:$0xff] }
 0x188   : > { %2916 = vmatpush3.bf16.msra.mxu0 %v2915_v33  ;;  %2948 = vmatpush3.bf16.msra.mxu1 %v2947_v62  ;;  %v1120_v33 = vmul.f32 %v3775_v53, %v3775_v53  ;;  %v1121_v62 = vmul.f32 %v3783_v57, %v3783_v57  ;;  %v1092_v19 = vmul.f32 %v4816_v23, %v4816_v23  ;;  %v4821_v23 = vld [vmem:[#allocation43_spill] sm:$0xff] }
 0x189   : > { %2918 = vmatprep.subr.bf16.mxu0 %v2917_v27  ;;  %2950 = vmatprep.subr.bf16.mxu1 %v2949_v1  ;;  %v2925_v27 = vpack.c.bf16 %v1105_v6, %v1104_v29  ;;  %v2957_v1 = vpack.c.bf16 %v1137_v31, %v1136_v4  ;;  %v1108_v29 = vmul.f32 %v3853_v28, %v3853_v28  ;;  %v4813_v6 = vld [vmem:[#allocation45_spill] sm:$0xff]  ;;  %v4814_v31 = vld [vmem:[#allocation42_spill] sm:$0xff] }
 0x18a   : > { %v2959_v30 = vpack.c.bf16 %v1121_v62, %v1120_v33  ;;  %v1109_v4 = vmul.f32 %v4813_v6, %v4813_v6  ;;  %v2961_v33 = vpack.c.bf16 %v1139_v8, %v1138_v9  ;;  %v2963_v25 = vpack.c.bf16 %v1123_v0, %v1122_v32  ;;  %v4822_v8 = vld [vmem:[#allocation41_spill] sm:$0xff]  ;;  %v4825_v0 = vld [vmem:[#allocation20_spill] sm:$0xff] }
 0x18b   : > { %v1124_v6 = vmul.f32 %v4818_v21, %v4818_v21  ;;  %v1110_v58 = vmul.f32 %v4820_v17, %v4820_v17  ;;  %v1111_v9 = vmul.f32 %v4821_v23, %v4821_v23 }
 0x18c   : > { %2920 = vmatpush3.bf16.msra.mxu0 %v2919_v41  ;;  %2952 = vmatpush3.bf16.msra.mxu1 %v2951_v60  ;;  %v1090_v41 = vmul.f32 %v3769_v50, %v3769_v50  ;;  %v1091_v60 = vmul.f32 %v3777_v54, %v3777_v54 }
 0x18d   : > { %2922 = vmatprep.subr.bf16.mxu0 %v2921_v63  ;;  %2954 = vmatprep.subr.bf16.mxu1 %v2953_v59  ;;  %v1140_v63 = vmul.f32 %v4814_v31, %v4814_v31  ;;  %v4815_v59 = vld [vmem:[#allocation46_spill] sm:$0xff]  ;;  %v1125_v31 = vmul.f32 %v4819_v15, %v4819_v15 }
 0x18e   : > { %v1141_v2 = vmul.f32 %v4815_v59, %v4815_v59  ;;  %v2931_v62 = vpack.c.bf16 %v1091_v60, %v1090_v41  ;;  %v1142_v41 = vmul.f32 %v4822_v8, %v4822_v8  ;;  %v4823_v60 = vld [vmem:[#allocation44_spill] sm:$0xff] }
 0x18f   : > { %v1143_v21 = vmul.f32 %v4823_v60, %v4823_v60  ;;  %v2967_v15 = vpack.c.bf16 %v1125_v31, %v1124_v6  ;;  %v936_v31 = vld [vmem:[#allocation2] sm:$0xff]  ;;  %v1079_v60 = vld [vmem:[#allocation3] sm:$0xff] }
 0x190   : > { %2924 = vmatpush3.bf16.msra.mxu0 %v2923_v40  ;;  %2956 = vmatpush3.bf16.msra.mxu1 %v2955_v61  ;;  %v4817_v40 = vld [vmem:[#allocation22_spill] sm:$0xff] }
 0x191   : > { %2926 = vmatprep.subr.bf16.mxu0 %v2925_v27  ;;  %2958 = vmatprep.subr.bf16.mxu1 %v2957_v1  ;;  %v1093_v61 = vmul.f32 %v4817_v40, %v4817_v40  ;;  %v2933_v27 = vpack.c.bf16 %v1109_v4, %v1108_v29  ;;  %v2965_v1 = vpack.c.bf16 %v1141_v2, %v1140_v63  ;;  %v4826_v63 = vld [vmem:[#allocation21_spill] sm:$0xff] }
 0x192   : > { %v1095_v29 = vmul.f32 %v4825_v0, %v4825_v0  ;;  %v1126_v4 = vmul.f32 %v4808_v26, %v4808_v26  ;;  %v1127_v59 = vmul.f32 %v4826_v63, %v4826_v63  ;;  %v2937_v2 = vpack.c.bf16 %v1111_v9, %v1110_v58 }
 0x193   : > { %v2935_v32 = vpack.c.bf16 %v1093_v61, %v1092_v19 }
 0x194   : > { %2928 = vmatpush3.bf16.msra.mxu0 %v2927_v5  ;;  %2960 = vmatpush3.bf16.msra.mxu1 %v2959_v30  ;;  %v4824_v5 = vld [vmem:[#allocation16_spill] sm:$0xff] }
 0x195   : > { %2930 = vmatprep.subr.bf16.mxu0 %v2929_v36  ;;  %2962 = vmatprep.subr.bf16.mxu1 %v2961_v33  ;;  %v1094_v30 = vmul.f32 %v4824_v5, %v4824_v5  ;;  %v2969_v36 = vpack.c.bf16 %v1143_v21, %v1142_v41  ;;  %v2971_v33 = vpack.c.bf16 %v1127_v59, %v1126_v4 }
 0x197   : > { %v2939_v19 = vpack.c.bf16 %v1095_v29, %v1094_v30 }
 0x198   : > { %2932 = vmatpush3.bf16.msra.mxu0 %v2931_v62  ;;  %2964 = vmatpush3.bf16.msra.mxu1 %v2963_v25 }
 0x199   : > { %2934 = vmatprep.subr.bf16.mxu0 %v2933_v27  ;;  %2966 = vmatprep.subr.bf16.mxu1 %v2965_v1 }
 0x19c   : > { %2936 = vmatpush3.bf16.msra.mxu0 %v2935_v32  ;;  %2968 = vmatpush3.bf16.msra.mxu1 %v2967_v15 }
 0x19d   : > { %2938 = vmatprep.subr.bf16.mxu0 %v2937_v2  ;;  %2970 = vmatprep.subr.bf16.mxu1 %v2969_v36 }
 0x1a0   : > { %2940 = vmatpush3.bf16.msra.mxu0 %v2939_v19  ;;  %2972 = vmatpush3.bf16.msra.mxu1 %v2971_v33 }
 0x1a3   : > { %1209 = vmatmul.mubr.f32.vlgmr.msra.gmra.mrb[2].mxu0 %v4812_v37  ;;  %1279 = vmatmul.mubr.f32.vlgmr.msra.gmra.mrb[2].mxu1 %v4812_v37 }
 0x256   : > { %v2533_v25 = vpop.f32.mrb[0].mxu0  ;;  %v2568_v26 = vpop.f32.mrb[0].mxu1 }
 0x257   : > { %v2534_v62 = vpop.f32.mrb[1].mxu0  ;;  %v2569_v40 = vpop.f32.mrb[1].mxu1 }
 0x258   : > { %v2535_v61 = vadd.f32 %v2534_v62, %v2533_v25  ;;  %v2570_v6 = vadd.f32 %v2569_v40, %v2568_v26 }
 0x25a   : > { %v1074_v27 = vadd.f32 %v2570_v6, %v2535_v61 }
 0x25c   : > { %v1077_v1 = vadd.f32 %v1074_v27, %v936_v31 }
 0x25e   : > { %1078 = vst [vmem:[#allocation2] sm:$0xff] %v1077_v1 }
 0x276   : > { %v2603_v17 = vpop.f32.mrb[2].mxu0  ;;  %v2638_v58 = vpop.f32.mrb[2].mxu1 }
 0x277   : > { %v2604_v23 = vpop.f32.mrb[3].mxu0  ;;  %v2639_v9 = vpop.f32.mrb[3].mxu1 }
 0x278   : > { %v2605_v8 = vadd.f32 %v2604_v23, %v2603_v17  ;;  %v2640_v41 = vadd.f32 %v2639_v9, %v2638_v58 }
 0x27a   : > { %v1281_v21 = vadd.f32 %v2640_v41, %v2605_v8 }
 0x27c   : > { %v1284_v32 = vadd.f32 %v1281_v21, %v1079_v60 }
 0x27e   : > { %1285 = vst [vmem:[#allocation3] sm:$0xff] %v1284_v32 }
 0x27f PF: > { %p1286_p13 = scmp.eq.s32.totalorder %s3487_s22, 1 }
 0x281   : > { %p1287_p0 = pnand %p1286_p13, %p926_p10 }
 0x282   : > { %v1292_v37 = vld [vmem:[%s4717_s4] sm:$0xff] (!%p1287_p0)  ;;  %v1293_v15 = vld [vmem:[%s4717_s4 + $0x8] sm:$0xff] (!%p1287_p0)  ;;  %v1294_v5 = vld [vmem:[%s4717_s4 + $0x10] sm:$0xff] (!%p1287_p0)  ;;  %v3505_v30 = vmov (!%p1287_p0), 0.0|0.0   ;;  %vm3506_vm1 = vmmov (!%p1287_p0), 0   ;;  %v3507_v4 = vmov (!%p1287_p0), 0.0  }
 0x283   : > { %1290 = sbr.rel (%p1287_p0) target bundleno = 1126 (0x466), region = 64  ;;  %2973 = vmatprep.subr.bf16.mxu0 (!%p1287_p0), %v3505_v30  ;;  %v2974_v0 = vpack.c.bf16 (!%p1287_p0), %v1293_v15, %v1292_v37  ;;  %2997 = vmatprep.subr.bf16.mxu1 (!%p1287_p0), %v3505_v30  ;;  %v1295_v29 = vld [vmem:[%s4717_s4 + $0x18] sm:$0xff] (!%p1287_p0)  ;;  %v1296_v59 = vld [vmem:[%s4717_s4 + $0x20] sm:$0xff] (!%p1287_p0)  ;;  %v1297_v2 = vld [vmem:[%s4717_s4 + $0x28] sm:$0xff] (!%p1287_p0) }
 0x284   : > { %2785 = vmatprep.mubr.msk.f32.mxu0 (!%p1287_p0), %vm3506_vm1, %v3507_v4  ;;  %2820 = vmatprep.mubr.msk.f32.mxu1 (!%p1287_p0), %vm3506_vm1, %v3507_v4  ;;  %v2977_v63 = vpack.c.bf16 (!%p1287_p0), %v1295_v29, %v1294_v5  ;;  %v2980_v36 = vpack.c.bf16 (!%p1287_p0), %v1297_v2, %v1296_v59  ;;  %v1298_v19 = vld [vmem:[%s4717_s4 + $0x30] sm:$0xff] (!%p1287_p0)  ;;  %v1299_v33 = vld [vmem:[%s4717_s4 + $0x38] sm:$0xff] (!%p1287_p0)  ;;  %v1300_v26 = vld [vmem:[%s4717_s4 + $0x40] sm:$0xff] (!%p1287_p0) }
 0x285   : > { %2975 = vmatpush3.bf16.msra.mxu0 (!%p1287_p0), %v2974_v0  ;;  %2999 = vmatpush3.bf16.msra.mxu1 (!%p1287_p0), %v2974_v0  ;;  %v2983_v25 = vpack.c.bf16 (!%p1287_p0), %v1299_v33, %v1298_v19  ;;  %v1301_v62 = vld [vmem:[%s4717_s4 + $0x48] sm:$0xff] (!%p1287_p0)  ;;  %v1302_v61 = vld [vmem:[%s4717_s4 + $0x50] sm:$0xff] (!%p1287_p0)  ;;  %v1303_v6 = vld [vmem:[%s4717_s4 + $0x58] sm:$0xff] (!%p1287_p0) }
 0x286   : > { %2976 = vmatprep.subr.bf16.mxu0 (!%p1287_p0), %v3505_v30  ;;  %3000 = vmatprep.subr.bf16.mxu1 (!%p1287_p0), %v3505_v30  ;;  %v2986_v40 = vpack.c.bf16 (!%p1287_p0), %v1301_v62, %v1300_v26  ;;  %v2989_v31 = vpack.c.bf16 (!%p1287_p0), %v1303_v6, %v1302_v61  ;;  %v1304_v27 = vld [vmem:[%s4717_s4 + $0x60] sm:$0xff] (!%p1287_p0)  ;;  %v1305_v1 = vld [vmem:[%s4717_s4 + $0x68] sm:$0xff] (!%p1287_p0)  ;;  %v1306_v58 = vld [vmem:[%s4717_s4 + $0x70] sm:$0xff] (!%p1287_p0) }
 0x287   : > { %v2992_v17 = vpack.c.bf16 (!%p1287_p0), %v1305_v1, %v1304_v27  ;;  %v1307_v23 = vld [vmem:[%s4717_s4 + $0x78] sm:$0xff] (!%p1287_p0)  ;;  %v1291_v8 = vld [vmem:[#allocation2] sm:$0xff] (!%p1287_p0)  ;;  %v1378_v41 = vld [vmem:[#allocation3] sm:$0xff] (!%p1287_p0) }
 0x288   : > { %v2995_v9 = vpack.c.bf16 (!%p1287_p0), %v1307_v23, %v1306_v58  ;;  %v1472_v60 = vld [vmem:[%s4718_s5] sm:$0xff] (!%p1287_p0)  ;;  %v1473_v21 = vld [vmem:[%s4718_s5 + $0x8] sm:$0xff] (!%p1287_p0)  ;;  %v1474_v32 = vld [vmem:[%s4718_s5 + $0x10] sm:$0xff] (!%p1287_p0) }
 0x289   : > { %2978 = vmatpush3.bf16.msra.mxu0 (!%p1287_p0), %v2977_v63  ;;  %3002 = vmatpush3.bf16.msra.mxu1 (!%p1287_p0), %v2977_v63  ;;  %v3022_v37 = vpack.c.bf16 (!%p1287_p0), %v1473_v21, %v1472_v60  ;;  %v1475_v15 = vld [vmem:[%s4718_s5 + $0x18] sm:$0xff] (!%p1287_p0) }
 0x28a   : > { %2979 = vmatprep.subr.bf16.mxu0 %v3505_v30  ;;  %3003 = vmatprep.subr.bf16.mxu1 %v3505_v30  ;;  %v3025_v5 = vpack.c.bf16 %v1475_v15, %v1474_v32 }
 0x28d   : > { %2981 = vmatpush3.bf16.msra.mxu0 %v2980_v36  ;;  %3005 = vmatpush3.bf16.msra.mxu1 %v2980_v36 }
 0x28e   : > { %2982 = vmatprep.subr.bf16.mxu0 %v3505_v30  ;;  %3006 = vmatprep.subr.bf16.mxu1 %v3505_v30 }
 0x291   : > { %2984 = vmatpush3.bf16.msra.mxu0 %v2983_v25  ;;  %3008 = vmatpush3.bf16.msra.mxu1 %v2983_v25  ;;  %v2458_v25 = vld [vmem:[#allocation6] ss:$0 sm:$0xff] }
 0x292   : > { %2985 = vmatprep.subr.bf16.mxu0 %v3505_v30  ;;  %3009 = vmatprep.subr.bf16.mxu1 %v3505_v30 }
 0x295   : > { %2987 = vmatpush3.bf16.msra.mxu0 %v2986_v40  ;;  %3011 = vmatpush3.bf16.msra.mxu1 %v2986_v40  ;;  %v2459_v40 = vld [vmem:[#allocation8] ss:$0 sm:$0xff] }
 0x296   : > { %2988 = vmatprep.subr.bf16.mxu0 %v3505_v30  ;;  %3012 = vmatprep.subr.bf16.mxu1 %v3505_v30 }
 0x299   : > { %2990 = vmatpush3.bf16.msra.mxu0 %v2989_v31  ;;  %3014 = vmatpush3.bf16.msra.mxu1 %v2989_v31 }
 0x29a   : > { %2991 = vmatprep.subr.bf16.mxu0 %v3505_v30  ;;  %3015 = vmatprep.subr.bf16.mxu1 %v3505_v30 }
 0x29d   : > { %2993 = vmatpush3.bf16.msra.mxu0 %v2992_v17  ;;  %3017 = vmatpush3.bf16.msra.mxu1 %v2992_v17 }
 0x29e   : > { %2994 = vmatprep.subr.bf16.mxu0 %v3505_v30  ;;  %3018 = vmatprep.subr.bf16.mxu1 %v3505_v30 }
 0x2a1   : > { %2996 = vmatpush3.bf16.msra.mxu0 %v2995_v9  ;;  %3020 = vmatpush3.bf16.msra.mxu1 %v2995_v9 }
 0x2a2   : > { %3021 = vmatprep.subr.bf16.mxu0 %v3505_v30  ;;  %3027 = vmatprep.subr.bf16.mxu1 %v3505_v30 }
 0x2a4   : > { %2786 = vmatmul.mubr.f32.vlgmr.msra.gmra.mrb[0].mxu0 %v1291_v8  ;;  %2821 = vmatmul.mubr.f32.vlgmr.msra.gmra.mrb[0].mxu1 %v1378_v41 }
 0x2a5   : > { %2831 = vmatprep.mubr.msk.f32.mxu0 %vm3506_vm1, %v3507_v4  ;;  %2842 = vmatprep.mubr.msk.f32.mxu1 %vm3506_vm1, %v3507_v4 }
 0x2a6   : > { %3023 = vmatpush3.bf16.msra.mxu0 %v3022_v37  ;;  %3029 = vmatpush3.bf16.msra.mxu1 %v3022_v37 }
 0x2a7   : > { %3024 = vmatprep.subr.bf16.mxu0 %v3505_v30  ;;  %3030 = vmatprep.subr.bf16.mxu1 %v3505_v30 }
 0x2aa   : > { %3026 = vmatpush3.bf16.msra.mxu0 %v3025_v5  ;;  %3032 = vmatpush3.bf16.msra.mxu1 %v3025_v5 }
 0x377   : > { %v1374_v0 = vpop.f32.mrb[0].mxu0  ;;  %v1445_v29 = vpop.f32.mrb[0].mxu1 }
 0x378   : > { %v1449_v4 = vmul.f32 0.00012207031, %v1374_v0  ;;  %v2787_v63 = vpop.f32.mrb[1].mxu0  ;;  %v1450_v59 = vmul.f32 0.00012207031, %v1445_v29  ;;  %v2822_v2 = vpop.f32.mrb[1].mxu1 }
 0x37a   : > { %v1451_v36 = vmul.f32 %v1449_v4, %v1449_v4 }
 0x37c   : > { %v1452_v19 = vsub.f32 %v1450_v59, %v1451_v36 }
 0x37e   : > { %v1454_v33 = vadd.f32 1e-05, %v1452_v19 }
 0x380   : > { %3137 = vrsqrt.f32 %v1454_v33 }
 0x38a   : > { %v3138_v26 = vpop.eup %3137 }
 0x38b   : > { %v1462_v62 = vmul.f32 %v3138_v26, %v2458_v25 }
 0x38d   : > { %2832 = vmatmul.mubr.msk.f32.vlgmr.msra.gmra.mrb[2].mxu0 %vm539_vm0, %v1462_v62  ;;  %v1464_v61 = vmul.f32 %v1462_v62, %v1449_v4 }
 0x38f   : > { %v1471_v30 = vsub.f32 %v2459_v40, %v1464_v61 }
 0x391   : > { %2843 = vmatmul.mubr.msk.f32.vlgmr.msra.gmra.mrb[2].mxu1 %vm539_vm0, %v1471_v30 }
 0x460   : > { %v1545_v6 = vpop.f32.mrb[2].mxu0 }
 0x461   : > { %1549 = vst [vmem:[#allocation4] sm:$0x1] %v1545_v6  ;;  %v2833_v31 = vpop.f32.mrb[3].mxu0 }
 0x464   : > { %v1623_v27 = vpop.f32.mrb[2].mxu1 }
 0x465   : > { %1627 = vst [vmem:[#allocation5] sm:$0x1] %v1623_v27  ;;  %v2844_v1 = vpop.f32.mrb[3].mxu1 }
 0x466 PF: > { %p2462_p1 = scmp.ne.s32.totalorder %s3487_s22, 1 }
 0x467   : > { %v4827_v23 = vld [vmem:[#allocation12_spill] sm:$0xff] (!%p2462_p1)  ;;  %v4828_v8 = vld [vmem:[#allocation14_spill] sm:$0xff] (!%p2462_p1) }
 0x468   : > { %1630 = sbr.rel (%p2462_p1) target bundleno = 1281 (0x501), region = 68  ;;  %v4158_v17 = vld [vmem:[#allocation4] ss:$0 sm:$0xff] (!%p2462_p1) }
 0x469   : > { %v1638_v9 = vmul.f32 (!%p2462_p1), %v4158_v17, %v4827_v23  ;;  %v1639_v41 = vmul.f32 (!%p2462_p1), %v4158_v17, %v4828_v8  ;;  %v1640_v60 = vmul.f32 (!%p2462_p1), %v3737_v34, %v4158_v17  ;;  %v1641_v21 = vmul.f32 (!%p2462_p1), %v3745_v38, %v4158_v17 }
 0x46a   : > { %v1642_v32 = vmul.f32 (!%p2462_p1), %v4158_v17, %v3757_v44  ;;  %v1643_v37 = vmul.f32 (!%p2462_p1), %v4158_v17, %v3765_v48  ;;  %v1644_v15 = vmul.f32 (!%p2462_p1), %v3753_v42, %v4158_v17  ;;  %v1645_v5 = vmul.f32 (!%p2462_p1), %v3761_v46, %v4158_v17 }
 0x46b   : > { %v1646_v61 = vmul.f32 (!%p2462_p1), %v4158_v17, %v3773_v52  ;;  %v1647_v27 = vmul.f32 (!%p2462_p1), %v4158_v17, %v3781_v56  ;;  %v1649_v52 = vmul.f32 (!%p2462_p1), %v3777_v54, %v4158_v17  ;;  %v4829_v56 = vld [vmem:[#allocation18_spill] sm:$0xff] (!%p2462_p1) }
 0x46c   : > { %v4160_v58 = vld [vmem:[#allocation5] ss:$0 sm:$0xff] (!%p2462_p1) }
 0x46d   : > { %v4179_v0 = vadd.f32 (!%p2462_p1), %v4160_v58, %v1638_v9  ;;  %v4182_v34 = vadd.f32 (!%p2462_p1), %v4160_v58, %v1639_v41  ;;  %v4185_v38 = vadd.f32 (!%p2462_p1), %v4160_v58, %v1640_v60  ;;  %v4188_v44 = vadd.f32 (!%p2462_p1), %v4160_v58, %v1641_v21 }
 0x46e   : > { %v4191_v48 = vadd.f32 (!%p2462_p1), %v4160_v58, %v1642_v32  ;;  %v4194_v42 = vadd.f32 (!%p2462_p1), %v4160_v58, %v1643_v37  ;;  %v4197_v46 = vadd.f32 (!%p2462_p1), %v4160_v58, %v1644_v15  ;;  %v4200_v29 = vadd.f32 (!%p2462_p1), %v4160_v58, %v1645_v5  ;;  %v4830_v32 = vld [vmem:[#allocation22_spill] sm:$0xff] (!%p2462_p1) }
 0x46f   : > { %v1773_v4 = vsub.f32 0.0, %v4179_v0  ;;  %v1774_v63 = vsub.f32 0.0, %v4182_v34  ;;  %v1775_v59 = vsub.f32 0.0, %v4185_v38  ;;  %v1776_v2 = vsub.f32 0.0, %v4188_v44 }
 0x470   : > { %v1777_v36 = vsub.f32 0.0, %v4191_v48  ;;  %v1778_v19 = vsub.f32 0.0, %v4194_v42  ;;  %v1779_v33 = vsub.f32 0.0, %v4197_v46  ;;  %v1780_v25 = vsub.f32 0.0, %v4200_v29 }
 0x471   : > { %v1837_v26 = vmul.f32 1.442695, %v1773_v4  ;;  %v1839_v62 = vmul.f32 1.442695, %v1774_v63  ;;  %v1841_v40 = vmul.f32 1.442695, %v1775_v59  ;;  %v4215_v9 = vadd.f32 %v4160_v58, %v1646_v61 }
 0x472   : > { %v1843_v30 = vmul.f32 1.442695, %v1776_v2  ;;  %v1845_v6 = vmul.f32 1.442695, %v1777_v36  ;;  %v1847_v31 = vmul.f32 1.442695, %v1778_v19  ;;  %v4218_v8 = vadd.f32 %v4160_v58, %v1647_v27 }
 0x473   : > { %3139 = vpow2.f32 %v1837_v26  ;;  %v1849_v1 = vmul.f32 1.442695, %v1779_v33  ;;  %v1851_v23 = vmul.f32 1.442695, %v1780_v25  ;;  %v1648_v41 = vmul.f32 %v3769_v50, %v4158_v17  ;;  %v4831_v33 = vld [vmem:[#allocation16_spill] sm:$0xff] }
 0x474   : > { %3141 = vpow2.f32 %v1839_v62  ;;  %v1781_v60 = vsub.f32 0.0, %v4215_v9  ;;  %v1650_v21 = vmul.f32 %v4158_v17, %v4829_v56  ;;  %v1651_v37 = vmul.f32 %v4158_v17, %v4830_v32 }
 0x475   : > { %3143 = vpow2.f32 %v1841_v40  ;;  %v1782_v15 = vsub.f32 0.0, %v4218_v8  ;;  %v4231_v5 = vadd.f32 %v4160_v58, %v1648_v41  ;;  %v4234_v50 = vadd.f32 %v4160_v58, %v1649_v52  ;;  %v4832_v40 = vld [vmem:[#allocation20_spill] sm:$0xff] }
 0x476   : > { %3145 = vpow2.f32 %v1843_v30  ;;  %v1853_v54 = vmul.f32 1.442695, %v1781_v60  ;;  %v4237_v4 = vadd.f32 %v4160_v58, %v1650_v21  ;;  %v4240_v63 = vadd.f32 %v4160_v58, %v1651_v37  ;;  %v4835_v21 = vld [vmem:[#allocation24_spill] sm:$0xff] }
 0x477   : > { %3147 = vpow2.f32 %v1845_v6  ;;  %v1855_v59 = vmul.f32 1.442695, %v1782_v15  ;;  %v1783_v2 = vsub.f32 0.0, %v4231_v5  ;;  %v1784_v36 = vsub.f32 0.0, %v4234_v50  ;;  %v4836_v37 = vld [vmem:[#allocation28_spill] sm:$0xff] }
 0x478   : > { %3149 = vpow2.f32 %v1847_v31  ;;  %v1785_v19 = vsub.f32 0.0, %v4237_v4  ;;  %v1652_v25 = vmul.f32 %v4831_v33, %v4158_v17  ;;  %v1653_v61 = vmul.f32 %v4832_v40, %v4158_v17 }
 0x479   : > { %3151 = vpow2.f32 %v1849_v1  ;;  %v1857_v26 = vmul.f32 1.442695, %v1783_v2  ;;  %v1859_v62 = vmul.f32 1.442695, %v1784_v36  ;;  %v1786_v6 = vsub.f32 0.0, %v4240_v63  ;;  %v4833_v1 = vld [vmem:[#allocation26_spill] sm:$0xff] }
 0x47a   : > { %3153 = vpow2.f32 %v1851_v23  ;;  %v1861_v30 = vmul.f32 1.442695, %v1785_v19  ;;  %v4251_v31 = vadd.f32 %v4160_v58, %v1652_v25  ;;  %v4254_v27 = vadd.f32 %v4160_v58, %v1653_v61  ;;  %v4834_v23 = vld [vmem:[#allocation30_spill] sm:$0xff] }
 0x47b   : > { %3155 = vpow2.f32 %v1853_v54  ;;  %v1654_v41 = vmul.f32 %v4158_v17, %v4833_v1  ;;  %v1655_v52 = vmul.f32 %v4158_v17, %v4834_v23  ;;  %v1656_v32 = vmul.f32 %v4835_v21, %v4158_v17 }
 0x47c   : > { %3157 = vpow2.f32 %v1855_v59  ;;  %v1787_v56 = vsub.f32 0.0, %v4251_v31  ;;  %v1657_v15 = vmul.f32 %v4836_v37, %v4158_v17  ;;  %v1788_v2 = vsub.f32 0.0, %v4254_v27 }
 0x47d   : > { %v3140_v60 = vpop.eup %3139  ;;  %3159 = vpow2.f32 %v1857_v26  ;;  %v4267_v36 = vadd.f32 %v4160_v58, %v1654_v41  ;;  %v4269_v25 = vmul.f32 1.442695, %v1786_v6  ;;  %v4272_v26 = vadd.f32 %v4160_v58, %v1655_v52 }
 0x47e   : > { %v3142_v54 = vpop.eup %3141  ;;  %v1965_v59 = vadd.f32 1.0, %v3140_v60  ;;  %3161 = vpow2.f32 %v1859_v62  ;;  %v4274_v1 = vmul.f32 1.442695, %v1787_v56  ;;  %v4279_v21 = vadd.f32 %v4160_v58, %v1656_v32 }
 0x47f   : > { %v3144_v19 = vpop.eup %3143  ;;  %v1966_v33 = vadd.f32 1.0, %v3142_v54  ;;  %3163 = vpow2.f32 %v1861_v30  ;;  %v1789_v62 = vsub.f32 0.0, %v4267_v36  ;;  %v1790_v41 = vsub.f32 0.0, %v4272_v26 }
 0x480   : > { %v3146_v40 = vpop.eup %3145  ;;  %3165 = vrcp.f32 %v1965_v59  ;;  %v1967_v61 = vadd.f32 1.0, %v3144_v19  ;;  %v4281_v52 = vmul.f32 1.442695, %v1788_v2  ;;  %v4284_v37 = vadd.f32 %v4160_v58, %v1657_v15 }
 0x481   : > { %v3148_v23 = vpop.eup %3147  ;;  %3167 = vrcp.f32 %v1966_v33  ;;  %v1968_v60 = vadd.f32 1.0, %v3146_v40  ;;  %v4286_v59 = vmul.f32 1.442695, %v1789_v62  ;;  %v1791_v19 = vsub.f32 0.0, %v4279_v21 }
 0x482   : > { %v3150_v30 = vpop.eup %3149  ;;  %3169 = vrcp.f32 %v1967_v61  ;;  %v1969_v6 = vadd.f32 1.0, %v3148_v23  ;;  %v4289_v32 = vmul.f32 1.442695, %v1790_v41  ;;  %v1658_v61 = vmul.f32 %v4158_v17, %v3821_v12 }
 0x483   : > { %v3152_v56 = vpop.eup %3151  ;;  %3171 = vrcp.f32 %v1968_v60  ;;  %v1970_v54 = vadd.f32 1.0, %v3150_v30  ;;  %v1792_v15 = vsub.f32 0.0, %v4284_v37  ;;  %v1659_v60 = vmul.f32 %v4158_v17, %v3829_v16 }
 0x484   : > { %v3154_v33 = vpop.eup %3153  ;;  %3173 = vrcp.f32 %v1969_v6  ;;  %v1971_v40 = vadd.f32 1.0, %v3152_v56  ;;  %v4296_v11 = vmul.f32 1.442695, %v1791_v19  ;;  %v4299_v6 = vadd.f32 %v4160_v58, %v1658_v61 }
 0x485   : > { %v3156_v2 = vpop.eup %3155  ;;  %3175 = vrcp.f32 %v1970_v54  ;;  %v1972_v23 = vadd.f32 1.0, %v3154_v33  ;;  %v4302_v12 = vadd.f32 %v4160_v58, %v1659_v60  ;;  %v1660_v54 = vmul.f32 %v3817_v10, %v4158_v17 }
 0x486   : > { %v3158_v62 = vpop.eup %3157  ;;  %3177 = vrcp.f32 %v1971_v40  ;;  %v1973_v30 = vadd.f32 1.0, %v3156_v2  ;;  %v1793_v40 = vsub.f32 0.0, %v4299_v6  ;;  %v1661_v19 = vmul.f32 %v3825_v14, %v4158_v17 }
 0x487   : > { %v3160_v41 = vpop.eup %3159  ;;  %3179 = vrcp.f32 %v1972_v23  ;;  %v1974_v56 = vadd.f32 1.0, %v3158_v62  ;;  %v1794_v23 = vsub.f32 0.0, %v4302_v12  ;;  %v4311_v62 = vadd.f32 %v4160_v58, %v1660_v54 }
 0x488   : > { %v3162_v33 = vpop.eup %3161  ;;  %3181 = vrcp.f32 %v1973_v30  ;;  %v1975_v16 = vadd.f32 1.0, %v3160_v41  ;;  %v1875_v13 = vmul.f32 1.442695, %v1792_v15  ;;  %v4314_v30 = vadd.f32 %v4160_v58, %v1661_v19 }
 0x489   : > { %v3164_v2 = vpop.eup %3163  ;;  %3183 = vrcp.f32 %v1974_v56  ;;  %v1976_v61 = vadd.f32 1.0, %v3162_v33  ;;  %v1877_v14 = vmul.f32 1.442695, %v1793_v40  ;;  %v1795_v56 = vsub.f32 0.0, %v4311_v62 }
 0x48a   : > { %v3166_v60 = vpop.eup %3165  ;;  %3185 = vrcp.f32 %v1975_v16  ;;  %v1977_v10 = vadd.f32 1.0, %v3164_v2  ;;  %v1879_v3 = vmul.f32 1.442695, %v1794_v23  ;;  %v1662_v15 = vmul.f32 %v4158_v17, %v3837_v20 }
 0x48b   : > { %v3168_v41 = vpop.eup %3167  ;;  %v2157_v7 = vmul.f32 %v3166_v60, %v4179_v0  ;;  %3187 = vrcp.f32 %v1976_v61  ;;  %v1796_v0 = vsub.f32 0.0, %v4314_v30  ;;  %v1663_v40 = vmul.f32 %v4158_v17, %v3845_v24 }
 0x48c   : > { %v3170_v33 = vpop.eup %3169  ;;  %v2158_v54 = vmul.f32 %v3168_v41, %v4182_v34  ;;  %3189 = vrcp.f32 %v1977_v10  ;;  %v1881_v20 = vmul.f32 1.442695, %v1795_v56 }
 0x48d   : > { %v3172_v16 = vpop.eup %3171  ;;  %2221 = vst [vmem:[%s3660_s17] sm:$0xff] %v2157_v7  ;;  %v2159_v19 = vmul.f32 %v3170_v33, %v4185_v38  ;;  %3191 = vpow2.f32 %v4269_v25  ;;  %v4331_v7 = vadd.f32 %v4160_v58, %v1662_v15  ;;  %v4337_v24 = vadd.f32 %v4160_v58, %v1663_v40 }
 0x48e   : > { %v3174_v2 = vpop.eup %3173  ;;  %2222 = vst [vmem:[%s3660_s17 + $0x8] sm:$0xff] %v2158_v54  ;;  %v2160_v34 = vmul.f32 %v3172_v16, %v4188_v44  ;;  %3193 = vpow2.f32 %v4274_v1  ;;  %v1664_v44 = vmul.f32 %v3833_v18, %v4158_v17  ;;  %v1666_v15 = vmul.f32 %v4158_v17, %v3853_v28 }
 0x48f   : > { %v3176_v38 = vpop.eup %3175  ;;  %2223 = vst [vmem:[%s3660_s17 + $0x10] sm:$0xff] %v2159_v19  ;;  %v2161_v25 = vmul.f32 %v3174_v2, %v4191_v48  ;;  %3195 = vpow2.f32 %v4281_v52  ;;  %v1797_v23 = vsub.f32 0.0, %v4331_v7  ;;  %v1665_v48 = vmul.f32 %v3841_v22, %v4158_v17 }
 0x490   : > { %v3178_v61 = vpop.eup %3177  ;;  %2224 = vst [vmem:[%s3660_s17 + $0x18] sm:$0xff] %v2160_v34  ;;  %v2162_v1 = vmul.f32 %v3176_v38, %v4194_v42  ;;  %3197 = vpow2.f32 %v4286_v59  ;;  %v1798_v18 = vsub.f32 0.0, %v4337_v24  ;;  %v4352_v10 = vadd.f32 %v4160_v58, %v1664_v44  ;;  %v4838_v34 = vld [vmem:[#allocation40_spill] sm:$0xff]  ;;  %v4839_v44 = vld [vmem:[#allocation43_spill] sm:$0xff] }
 0x491   : > { %v3180_v52 = vpop.eup %3179  ;;  %2225 = vst [vmem:[%s3660_s17 + $0x20] sm:$0xff] %v2161_v25  ;;  %v2163_v60 = vmul.f32 %v3178_v61, %v4197_v46  ;;  %3199 = vpow2.f32 %v4289_v32  ;;  %v1883_v22 = vmul.f32 1.442695, %v1796_v0  ;;  %v4358_v41 = vadd.f32 %v4160_v58, %v1665_v48 }
 0x492   : > { %v3182_v42 = vpop.eup %3181  ;;  %2226 = vst [vmem:[%s3660_s17 + $0x28] sm:$0xff] %v2162_v1  ;;  %v2164_v59 = vmul.f32 %v3180_v52, %v4200_v29  ;;  %3201 = vpow2.f32 %v4296_v11  ;;  %v1885_v56 = vmul.f32 1.442695, %v1797_v23  ;;  %v1799_v33 = vsub.f32 0.0, %v4352_v10 }
 0x493   : > { %v3184_v46 = vpop.eup %3183  ;;  %2227 = vst [vmem:[%s3660_s17 + $0x30] sm:$0xff] %v2163_v60  ;;  %v2165_v32 = vmul.f32 %v3182_v42, %v4215_v9  ;;  %3203 = vpow2.f32 %v1875_v13  ;;  %v1887_v11 = vmul.f32 1.442695, %v1798_v18  ;;  %v1800_v13 = vsub.f32 0.0, %v4358_v41  ;;  %v4837_v9 = vld [vmem:[#allocation45_spill] sm:$0xff] }
 0x494   : > { %v3186_v54 = vpop.eup %3185  ;;  %2228 = vst [vmem:[%s3660_s17 + $0x38] sm:$0xff] %v2164_v59  ;;  %v2166_v29 = vmul.f32 %v3184_v46, %v4218_v8  ;;  %3205 = vpow2.f32 %v1877_v14  ;;  %v1667_v0 = vmul.f32 %v4158_v17, %v4837_v9  ;;  %v4374_v14 = vmul.f32 1.442695, %v1799_v33 }
 0x495   : > { %v3188_v16 = vpop.eup %3187  ;;  %2229 = vst [vmem:[%s3660_s17 + $0x40] sm:$0xff] %v2165_v32  ;;  %v2167_v19 = vmul.f32 %v3186_v54, %v4231_v5  ;;  %3207 = vpow2.f32 %v1879_v3  ;;  %v4377_v28 = vadd.f32 %v4160_v58, %v1666_v15  ;;  %v1668_v38 = vmul.f32 %v4838_v34, %v4158_v17 }
 0x496   : > { %v3190_v40 = vpop.eup %3189  ;;  %2230 = vst [vmem:[%s3660_s17 + $0x48] sm:$0xff] %v2166_v29  ;;  %v2168_v8 = vmul.f32 %v3188_v16, %v4234_v50  ;;  %3209 = vpow2.f32 %v1881_v20  ;;  %v4382_v5 = vadd.f32 %v4160_v58, %v1667_v0  ;;  %v1669_v61 = vmul.f32 %v4839_v44, %v4158_v17  ;;  %v4840_v29 = vld [vmem:[#allocation13_spill] sm:$0xff] }
 0x497   : > { %v3192_v2 = vpop.eup %3191  ;;  %2231 = vst [vmem:[%s3660_s17 + $0x50] sm:$0xff] %v2167_v19  ;;  %v2169_v3 = vmul.f32 %v3190_v40, %v4237_v4  ;;  %3211 = vpow2.f32 %v1883_v22  ;;  %v1801_v20 = vsub.f32 0.0, %v4377_v28  ;;  %v4393_v48 = vadd.f32 %v4160_v58, %v1668_v38 }
 0x498   : > { %v3194_v25 = vpop.eup %3193  ;;  %2232 = vst [vmem:[%s3660_s17 + $0x58] sm:$0xff] %v2168_v8  ;;  %v1978_v50 = vadd.f32 1.0, %v3192_v2  ;;  %3213 = vpow2.f32 %v1885_v56  ;;  %v1802_v4 = vsub.f32 0.0, %v4382_v5  ;;  %v4395_v18 = vmul.f32 1.442695, %v1800_v13  ;;  %v4841_v13 = vld [vmem:[#allocation15_spill] sm:$0xff] }
 0x499   : > { %v3196_v1 = vpop.eup %3195  ;;  %2233 = vst [vmem:[%s3660_s17 + $0x60] sm:$0xff] %v2169_v3  ;;  %v1979_v23 = vadd.f32 1.0, %v3194_v25  ;;  %3215 = vpow2.f32 %v1887_v11  ;;  %v4398_v42 = vadd.f32 %v4160_v58, %v1669_v61  ;;  %v4400_v46 = vmul.f32 1.442695, %v1801_v20 }
 0x49a   : > { %v3198_v52 = vpop.eup %3197  ;;  %3217 = vrcp.f32 %v1978_v50  ;;  %v1980_v60 = vadd.f32 1.0, %v3196_v1  ;;  %v1803_v32 = vsub.f32 0.0, %v4393_v48  ;;  %v4403_v54 = vmul.f32 1.442695, %v1802_v4 }
 0x49b   : > { %v3200_v59 = vpop.eup %3199  ;;  %3219 = vrcp.f32 %v1979_v23  ;;  %v1981_v22 = vadd.f32 1.0, %v3198_v52  ;;  %v1670_v11 = vmul.f32 %v4158_v17, %v4840_v29  ;;  %v1804_v19 = vsub.f32 0.0, %v4398_v42 }
 0x49c   : > { %v3202_v56 = vpop.eup %3201  ;;  %3221 = vrcp.f32 %v1980_v60  ;;  %v1982_v33 = vadd.f32 1.0, %v3200_v59  ;;  %v1671_v9 = vmul.f32 %v4158_v17, %v4841_v13  ;;  %v4410_v8 = vmul.f32 1.442695, %v1803_v32 }
 0x49d   : > { %v3204_v15 = vpop.eup %3203  ;;  %3223 = vrcp.f32 %v1981_v22  ;;  %v1983_v16 = vadd.f32 1.0, %v3202_v56  ;;  %v4413_v2 = vadd.f32 %v4160_v58, %v1670_v11  ;;  %v1672_v25 = vmul.f32 %v3739_v35, %v4158_v17 }
 0x49e   : > { %v3206_v0 = vpop.eup %3205  ;;  %3225 = vrcp.f32 %v1982_v33  ;;  %v1984_v40 = vadd.f32 1.0, %v3204_v15  ;;  %v4416_v38 = vadd.f32 %v4160_v58, %v1671_v9  ;;  %v1673_v61 = vmul.f32 %v3747_v39, %v4158_v17 }
 0x49f   : > { %v3208_v3 = vpop.eup %3207  ;;  %3227 = vrcp.f32 %v1983_v16  ;;  %v1985_v34 = vadd.f32 1.0, %v3206_v0  ;;  %v1805_v44 = vsub.f32 0.0, %v4413_v2  ;;  %v4425_v52 = vadd.f32 %v4160_v58, %v1672_v25 }
 0x4a0   : > { %v3210_v50 = vpop.eup %3209  ;;  %3229 = vrcp.f32 %v1984_v40  ;;  %v1986_v20 = vadd.f32 1.0, %v3208_v3  ;;  %v1806_v4 = vsub.f32 0.0, %v4416_v38  ;;  %v1899_v35 = vmul.f32 1.442695, %v1804_v19 }
 0x4a1   : > { %v3212_v1 = vpop.eup %3211  ;;  %3231 = vrcp.f32 %v1985_v34  ;;  %v1987_v23 = vadd.f32 1.0, %v3210_v50  ;;  %v4428_v22 = vadd.f32 %v4160_v58, %v1673_v61  ;;  %v1901_v33 = vmul.f32 1.442695, %v1805_v44 }
 0x4a2   : > { %v3214_v60 = vpop.eup %3213  ;;  %3233 = vrcp.f32 %v1986_v20  ;;  %v1988_v59 = vadd.f32 1.0, %v3212_v1  ;;  %v1807_v39 = vsub.f32 0.0, %v4425_v52  ;;  %v1903_v15 = vmul.f32 1.442695, %v1806_v4 }
 0x4a3   : > { %v3216_v32 = vpop.eup %3215  ;;  %3235 = vrcp.f32 %v1987_v23  ;;  %v1989_v56 = vadd.f32 1.0, %v3214_v60  ;;  %v1674_v16 = vmul.f32 %v4158_v17, %v3759_v45  ;;  %v1808_v9 = vsub.f32 0.0, %v4428_v22 }
 0x4a4   : > { %v3218_v29 = vpop.eup %3217  ;;  %3237 = vrcp.f32 %v1988_v59  ;;  %v1990_v11 = vadd.f32 1.0, %v3216_v32  ;;  %v1675_v0 = vmul.f32 %v4158_v17, %v3767_v49  ;;  %v1905_v34 = vmul.f32 1.442695, %v1807_v39 }
 0x4a5   : > { %v3220_v13 = vpop.eup %3219  ;;  %v2170_v19 = vmul.f32 %v3218_v29, %v4240_v63  ;;  %3239 = vrcp.f32 %v1989_v56  ;;  %v4439_v25 = vadd.f32 %v4160_v58, %v1674_v16  ;;  %v1676_v49 = vmul.f32 %v3755_v43, %v4158_v17 }
 0x4a6   : > { %v3222_v40 = vpop.eup %3221  ;;  %v2171_v3 = vmul.f32 %v3220_v13, %v4251_v31  ;;  %3241 = vrcp.f32 %v1990_v11  ;;  %v4445_v50 = vadd.f32 %v4160_v58, %v1675_v0  ;;  %v1678_v32 = vmul.f32 %v4158_v17, %v3775_v53 }
 0x4a7   : > { %v3224_v45 = vpop.eup %3223  ;;  %2234 = vst [vmem:[%s3660_s17 + $0x68] sm:$0xff] %v2170_v19  ;;  %v2172_v63 = vmul.f32 %v3222_v40, %v4254_v27  ;;  %3243 = vpow2.f32 %v4374_v14  ;;  %v1809_v44 = vsub.f32 0.0, %v4439_v25  ;;  %v1677_v27 = vmul.f32 %v3763_v47, %v4158_v17 }
 0x4a8   : > { %v3226_v31 = vpop.eup %3225  ;;  %2235 = vst [vmem:[%s3660_s17 + $0x70] sm:$0xff] %v2171_v3  ;;  %v2173_v20 = vmul.f32 %v3224_v45, %v4267_v36  ;;  %3245 = vpow2.f32 %v4395_v18  ;;  %v1810_v43 = vsub.f32 0.0, %v4445_v50  ;;  %v4460_v1 = vadd.f32 %v4160_v58, %v1676_v49  ;;  %v4842_v49 = vld [vmem:[#allocation19_spill] sm:$0xff] }
 0x4a9   : > { %v3228_v14 = vpop.eup %3227  ;;  %2236 = vst [vmem:[%s3660_s17 + $0x78] sm:$0xff] %v2172_v63  ;;  %v2174_v61 = vmul.f32 %v3226_v31, %v4272_v26  ;;  %3247 = vpow2.f32 %v4400_v46  ;;  %v1907_v47 = vmul.f32 1.442695, %v1808_v9  ;;  %v4466_v23 = vadd.f32 %v4160_v58, %v1677_v27 }
 0x4aa   : > { %v3230_v36 = vpop.eup %3229  ;;  %2237 = vst [vmem:[%s3660_s17 + $0x80] sm:$0xff] %v2173_v20  ;;  %v2175_v18 = vmul.f32 %v3228_v14, %v4279_v21  ;;  %3249 = vpow2.f32 %v4403_v54  ;;  %v1909_v4 = vmul.f32 1.442695, %v1809_v44  ;;  %v1811_v60 = vsub.f32 0.0, %v4460_v1  ;;  %v4843_v14 = vld [vmem:[#allocation23_spill] sm:$0xff] }
 0x4ab   : > { %v3232_v26 = vpop.eup %3231  ;;  %2238 = vst [vmem:[%s3660_s17 + $0x88] sm:$0xff] %v2174_v61  ;;  %v2176_v46 = vmul.f32 %v3230_v36, %v4284_v37  ;;  %3251 = vpow2.f32 %v4410_v8  ;;  %v1911_v54 = vmul.f32 1.442695, %v1810_v43  ;;  %v1812_v8 = vsub.f32 0.0, %v4466_v23 }
 0x4ac   : > { %v3234_v59 = vpop.eup %3233  ;;  %2239 = vst [vmem:[%s3660_s17 + $0x90] sm:$0xff] %v2175_v18  ;;  %v2177_v21 = vmul.f32 %v3232_v26, %v4299_v6  ;;  %3253 = vpow2.f32 %v1899_v35  ;;  %v1679_v39 = vmul.f32 %v4158_v17, %v3783_v57  ;;  %v1913_v35 = vmul.f32 1.442695, %v1811_v60  ;;  %v4844_v60 = vld [vmem:[#allocation17_spill] sm:$0xff] }
 0x4ad   : > { %v3236_v56 = vpop.eup %3235  ;;  %2240 = vst [vmem:[%s3660_s17 + $0x98] sm:$0xff] %v2176_v46  ;;  %v2178_v37 = vmul.f32 %v3234_v59, %v4302_v12  ;;  %3255 = vpow2.f32 %v1901_v33  ;;  %v4484_v53 = vadd.f32 %v4160_v58, %v1678_v32  ;;  %v1680_v57 = vmul.f32 %v3771_v51, %v4158_v17 }
 0x4ae   : > { %v3238_v29 = vpop.eup %3237  ;;  %2241 = vst [vmem:[%s3660_s17 + $0xa0] sm:$0xff] %v2177_v21  ;;  %v2179_v6 = vmul.f32 %v3236_v56, %v4311_v62  ;;  %3257 = vpow2.f32 %v1903_v15  ;;  %v4489_v33 = vadd.f32 %v4160_v58, %v1679_v39  ;;  %v1681_v13 = vmul.f32 %v3779_v55, %v4158_v17  ;;  %v4845_v56 = vld [vmem:[#allocation21_spill] sm:$0xff] }
 0x4af   : > { %v3240_v11 = vpop.eup %3239  ;;  %2242 = vst [vmem:[%s3660_s17 + $0xa8] sm:$0xff] %v2178_v37  ;;  %v2180_v12 = vmul.f32 %v3238_v29, %v4314_v30  ;;  %3259 = vpow2.f32 %v1905_v34  ;;  %v1813_v15 = vsub.f32 0.0, %v4484_v53  ;;  %v4501_v9 = vadd.f32 %v4160_v58, %v1680_v57 }
 0x4b0   : > { %v3242_v16 = vpop.eup %3241  ;;  %2243 = vst [vmem:[%s3660_s17 + $0xb0] sm:$0xff] %v2179_v6  ;;  %v2181_v62 = vmul.f32 %v3240_v11, %v4331_v7  ;;  %3261 = vpow2.f32 %v1907_v47  ;;  %v4505_v7 = vadd.f32 %v4160_v58, %v1681_v13  ;;  %v4508_v55 = vmul.f32 1.442695, %v1812_v8 }
 0x4b1   : > { %v3244_v30 = vpop.eup %3243  ;;  %2244 = vst [vmem:[%s3660_s17 + $0xb8] sm:$0xff] %v2180_v12  ;;  %v2182_v19 = vmul.f32 %v3242_v16, %v4337_v24  ;;  %3263 = vpow2.f32 %v1909_v4  ;;  %v1814_v34 = vsub.f32 0.0, %v4489_v33  ;;  %v4511_v63 = vmul.f32 1.442695, %v1813_v15 }
 0x4b2   : > { %v3246_v51 = vpop.eup %3245  ;;  %2245 = vst [vmem:[%s3660_s17 + $0xc0] sm:$0xff] %v2181_v62  ;;  %v1991_v0 = vadd.f32 1.0, %v3244_v30  ;;  %3265 = vpow2.f32 %v1911_v54  ;;  %v1682_v31 = vmul.f32 %v4158_v17, %v4842_v49  ;;  %v1815_v27 = vsub.f32 0.0, %v4501_v9 }
 0x4b3   : > { %v3248_v40 = vpop.eup %3247  ;;  %2246 = vst [vmem:[%s3660_s17 + $0xc8] sm:$0xff] %v2182_v19  ;;  %v1992_v3 = vadd.f32 1.0, %v3246_v51  ;;  %3267 = vpow2.f32 %v1913_v35  ;;  %v1683_v61 = vmul.f32 %v4158_v17, %v4843_v14  ;;  %v1816_v18 = vsub.f32 0.0, %v4505_v7 }
 0x4b4   : > { %v3250_v24 = vpop.eup %3249  ;;  %3269 = vrcp.f32 %v1991_v0  ;;  %v1993_v45 = vadd.f32 1.0, %v3248_v40  ;;  %v4520_v47 = vadd.f32 %v4160_v58, %v1682_v31  ;;  %v1684_v59 = vmul.f32 %v4844_v60, %v4158_v17  ;;  %v4846_v0 = vld [vmem:[#allocation27_spill] sm:$0xff] }
 0x4b5   : > { %v3252_v20 = vpop.eup %3251  ;;  %3271 = vrcp.f32 %v1992_v3  ;;  %v1994_v44 = vadd.f32 1.0, %v3250_v24  ;;  %v4523_v4 = vadd.f32 %v4160_v58, %v1683_v61  ;;  %v1685_v37 = vmul.f32 %v4845_v56, %v4158_v17 }
 0x4b6   : > { %v3254_v43 = vpop.eup %3253  ;;  %3273 = vrcp.f32 %v1993_v45  ;;  %v1995_v36 = vadd.f32 1.0, %v3252_v20  ;;  %v1817_v32 = vsub.f32 0.0, %v4520_v47  ;;  %v1919_v29 = vmul.f32 1.442695, %v1814_v34  ;;  %v4847_v45 = vld [vmem:[#allocation31_spill] sm:$0xff] }
 0x4b7   : > { %v3256_v26 = vpop.eup %3255  ;;  %3275 = vrcp.f32 %v1994_v44  ;;  %v1996_v46 = vadd.f32 1.0, %v3254_v43  ;;  %v1818_v6 = vsub.f32 0.0, %v4523_v4  ;;  %v1921_v12 = vmul.f32 1.442695, %v1815_v27 }
 0x4b8   : > { %v3258_v21 = vpop.eup %3257  ;;  %3277 = vrcp.f32 %v1995_v36  ;;  %v1997_v54 = vadd.f32 1.0, %v3256_v26  ;;  %v4532_v57 = vadd.f32 %v4160_v58, %v1684_v59  ;;  %v1923_v15 = vmul.f32 1.442695, %v1816_v18  ;;  %v4848_v36 = vld [vmem:[#allocation25_spill] sm:$0xff] }
 0x4b9   : > { %v3260_v8 = vpop.eup %3259  ;;  %3279 = vrcp.f32 %v1996_v46  ;;  %v1998_v39 = vadd.f32 1.0, %v3258_v21  ;;  %v1925_v13 = vmul.f32 1.442695, %v1817_v32  ;;  %v4535_v51 = vadd.f32 %v4160_v58, %v1685_v37  ;;  %v4849_v59 = vld [vmem:[#allocation29_spill] sm:$0xff] }
 0x4ba   : > { %v3262_v35 = vpop.eup %3261  ;;  %3281 = vrcp.f32 %v1997_v54  ;;  %v1999_v11 = vadd.f32 1.0, %v3260_v8  ;;  %v1686_v40 = vmul.f32 %v4158_v17, %v4846_v0  ;;  %v1927_v24 = vmul.f32 1.442695, %v1818_v6 }
 0x4bb   : > { %v3264_v16 = vpop.eup %3263  ;;  %3283 = vrcp.f32 %v1998_v39  ;;  %v2000_v62 = vadd.f32 1.0, %v3262_v35  ;;  %v1687_v49 = vmul.f32 %v4158_v17, %v4847_v45  ;;  %v1819_v44 = vsub.f32 0.0, %v4532_v57 }
 0x4bc   : > { %v3266_v30 = vpop.eup %3265  ;;  %3285 = vrcp.f32 %v1999_v11  ;;  %v2001_v19 = vadd.f32 1.0, %v3264_v16  ;;  %v4543_v27 = vadd.f32 %v4160_v58, %v1686_v40  ;;  %v1688_v18 = vmul.f32 %v4848_v36, %v4158_v17  ;;  %v4850_v16 = vld [vmem:[#allocation33_spill] sm:$0xff] }
 0x4bd   : > { %v3268_v3 = vpop.eup %3267  ;;  %3287 = vrcp.f32 %v2000_v62  ;;  %v2002_v34 = vadd.f32 1.0, %v3266_v30  ;;  %v4547_v43 = vadd.f32 %v4160_v58, %v1687_v49  ;;  %v1820_v60 = vsub.f32 0.0, %v4535_v51 }
 0x4be   : > { %v3270_v31 = vpop.eup %3269  ;;  %3289 = vrcp.f32 %v2001_v19  ;;  %v2003_v20 = vadd.f32 1.0, %v3268_v3  ;;  %v1689_v21 = vmul.f32 %v4849_v59, %v4158_v17  ;;  %v1821_v32 = vsub.f32 0.0, %v4543_v27 }
 0x4bf   : > { %v3272_v14 = vpop.eup %3271  ;;  %v2183_v61 = vmul.f32 %v3270_v31, %v4352_v10  ;;  %3291 = vrcp.f32 %v2002_v34  ;;  %v4560_v56 = vadd.f32 %v4160_v58, %v1688_v18  ;;  %v1822_v8 = vsub.f32 0.0, %v4547_v43 }
 0x4c0   : > { %v3274_v26 = vpop.eup %3273  ;;  %v2184_v46 = vmul.f32 %v3272_v14, %v4358_v41  ;;  %3293 = vrcp.f32 %v2003_v20  ;;  %v4567_v39 = vadd.f32 %v4160_v58, %v1689_v21  ;;  %v1929_v6 = vmul.f32 1.442695, %v1819_v44 }
 0x4c1   : > { %v3276_v54 = vpop.eup %3275  ;;  %2247 = vst [vmem:[%s3660_s17 + $0xd0] sm:$0xff] %v2183_v61  ;;  %v2185_v10 = vmul.f32 %v3274_v26, %v4377_v28  ;;  %3295 = vpow2.f32 %v4508_v55  ;;  %v1823_v35 = vsub.f32 0.0, %v4560_v56  ;;  %v1690_v62 = vmul.f32 %v4158_v17, %v4850_v16  ;;  %v3396_v16 = vld [vmem:[#allocation5] ss:$0 sm:$0xff] }
 0x4c2   : > { %v3278_v41 = vpop.eup %3277  ;;  %2248 = vst [vmem:[%s3660_s17 + $0xd8] sm:$0xff] %v2184_v46  ;;  %v2186_v37 = vmul.f32 %v3276_v54, %v4382_v5  ;;  %3297 = vpow2.f32 %v4511_v63  ;;  %v1931_v63 = vmul.f32 1.442695, %v1820_v60  ;;  %v1935_v3 = vmul.f32 1.442695, %v1822_v8  ;;  %v4854_v54 = vld [vmem:[#allocation37_spill] sm:$0xff] }
 0x4c3   : > { %v3280_v28 = vpop.eup %3279  ;;  %2249 = vst [vmem:[%s3660_s17 + $0xe0] sm:$0xff] %v2185_v10  ;;  %v2187_v55 = vmul.f32 %v3278_v41, %v4393_v48  ;;  %3299 = vpow2.f32 %v1919_v29  ;;  %v1824_v48 = vsub.f32 0.0, %v4567_v39  ;;  %v4851_v29 = vld [vmem:[#allocation35_spill] sm:$0xff] }
 0x4c4   : > { %v3282_v11 = vpop.eup %3281  ;;  %2250 = vst [vmem:[%s3660_s17 + $0xe8] sm:$0xff] %v2186_v37  ;;  %v2188_v5 = vmul.f32 %v3280_v28, %v4398_v42  ;;  %3301 = vpow2.f32 %v1921_v12  ;;  %v1691_v0 = vmul.f32 %v4158_v17, %v4851_v29  ;;  %v1933_v12 = vmul.f32 1.442695, %v1821_v32  ;;  %v4855_v8 = vld [vmem:[#allocation39_spill] sm:$0xff]  ;;  %v4856_v29 = vld [vmem:[#allocation36_spill] sm:$0xff] }
 0x4c5   : > { %v3284_v30 = vpop.eup %3283  ;;  %2251 = vst [vmem:[%s3660_s17 + $0xf0] sm:$0xff] %v2187_v55  ;;  %v2189_v19 = vmul.f32 %v3282_v11, %v4413_v2  ;;  %3303 = vpow2.f32 %v1923_v15  ;;  %v1937_v2 = vmul.f32 1.442695, %v1823_v35  ;;  %v4852_v15 = vld [vmem:[#allocation32_spill] sm:$0xff] }
 0x4c6   : > { %v3286_v40 = vpop.eup %3285  ;;  %2252 = vst [vmem:[%s3660_s17 + $0xf8] sm:$0xff] %v2188_v5  ;;  %v2190_v42 = vmul.f32 %v3284_v30, %v4416_v38  ;;  %3305 = vpow2.f32 %v1925_v13  ;;  %v1692_v49 = vmul.f32 %v4852_v15, %v4158_v17  ;;  %v4590_v38 = vadd.f32 %v4160_v58, %v1690_v62  ;;  %v4853_v13 = vld [vmem:[#allocation34_spill] sm:$0xff] }
 0x4c7   : > { %v3288_v34 = vpop.eup %3287  ;;  %2253 = vst [vmem:[%s3660_s17 + $0x100] sm:$0xff] %v2189_v19  ;;  %v2191_v45 = vmul.f32 %v3286_v40, %v4425_v52  ;;  %3307 = vpow2.f32 %v1927_v24  ;;  %v1693_v44 = vmul.f32 %v4853_v13, %v4158_v17  ;;  %v1939_v24 = vmul.f32 1.442695, %v1824_v48 }
 0x4c8   : > { %v3290_v31 = vpop.eup %3289  ;;  %2254 = vst [vmem:[%s3660_s17 + $0x108] sm:$0xff] %v2190_v42  ;;  %v2192_v20 = vmul.f32 %v3288_v34, %v4428_v22  ;;  %3309 = vpow2.f32 %v1929_v6  ;;  %v4597_v61 = vadd.f32 %v4160_v58, %v1691_v0  ;;  %v4604_v46 = vadd.f32 %v4160_v58, %v1692_v49 }
 0x4c9   : > { %v3292_v14 = vpop.eup %3291  ;;  %2255 = vst [vmem:[%s3660_s17 + $0x110] sm:$0xff] %v2191_v45  ;;  %v2193_v52 = vmul.f32 %v3290_v31, %v4439_v25  ;;  %3311 = vpow2.f32 %v1931_v63  ;;  %v4607_v25 = vadd.f32 %v4160_v58, %v1693_v44  ;;  %v1825_v21 = vsub.f32 0.0, %v4590_v38  ;;  %v3395_v58 = vld [vmem:[#allocation4] ss:$0 sm:$0xff]  ;;  %v4858_v44 = vld [vmem:[#allocation42_spill] sm:$0xff] }
 0x4ca   : > { %v3294_v36 = vpop.eup %3293  ;;  %2256 = vst [vmem:[%s3660_s17 + $0x118] sm:$0xff] %v2192_v20  ;;  %v2194_v22 = vmul.f32 %v3292_v14, %v4445_v50  ;;  %3313 = vpow2.f32 %v1933_v12  ;;  %v1694_v50 = vmul.f32 %v4158_v17, %v4854_v54  ;;  %v1695_v28 = vmul.f32 %v3395_v58, %v4855_v8 }
 0x4cb   : > { %v3296_v18 = vpop.eup %3295  ;;  %2257 = vst [vmem:[%s3660_s17 + $0x120] sm:$0xff] %v2193_v52  ;;  %v2195_v26 = vmul.f32 %v3294_v36, %v4460_v1  ;;  %3315 = vpow2.f32 %v1935_v3  ;;  %v1826_v1 = vsub.f32 0.0, %v4597_v61  ;;  %v1827_v35 = vsub.f32 0.0, %v4604_v46  ;;  %v4857_v3 = vld [vmem:[#allocation38_spill] sm:$0xff] }
 0x4cc   : > { %v3298_v60 = vpop.eup %3297  ;;  %2258 = vst [vmem:[%s3660_s17 + $0x128] sm:$0xff] %v2194_v22  ;;  %v2004_v59 = vadd.f32 1.0, %v3296_v18  ;;  %3317 = vpow2.f32 %v1937_v2  ;;  %v1828_v11 = vsub.f32 0.0, %v4607_v25  ;;  %v1941_v63 = vmul.f32 1.442695, %v1825_v21  ;;  %v4859_v22 = vld [vmem:[#allocation46_spill] sm:$0xff] }
 0x4cd   : > { %v3300_v10 = vpop.eup %3299  ;;  %2259 = vst [vmem:[%s3660_s17 + $0x130] sm:$0xff] %v2195_v26  ;;  %v2005_v32 = vadd.f32 1.0, %v3298_v60  ;;  %3319 = vpow2.f32 %v1939_v24  ;;  %v4618_v62 = vadd.f32 %v3396_v16, %v1694_v50  ;;  %v1943_v48 = vmul.f32 1.442695, %v1826_v1 }
 0x4ce   : > { %v3302_v41 = vpop.eup %3301  ;;  %3321 = vrcp.f32 %v2004_v59  ;;  %v2006_v37 = vadd.f32 1.0, %v3300_v10  ;;  %v1696_v0 = vmul.f32 %v3395_v58, %v4856_v29  ;;  %v4621_v12 = vadd.f32 %v3396_v16, %v1695_v28  ;;  %v4861_v28 = vld [vmem:[#allocation44_spill] sm:$0xff] }
 0x4cf   : > { %v3304_v55 = vpop.eup %3303  ;;  %3323 = vrcp.f32 %v2005_v32  ;;  %v2007_v6 = vadd.f32 1.0, %v3302_v41  ;;  %v1697_v34 = vmul.f32 %v3395_v58, %v4857_v3  ;;  %v1945_v15 = vmul.f32 1.442695, %v1827_v35  ;;  %v4860_v32 = vld [vmem:[#allocation41_spill] sm:$0xff] }
 0x4d0   : > { %v3306_v17 = vpop.eup %3305  ;;  %3325 = vrcp.f32 %v2006_v37  ;;  %v2008_v5 = vadd.f32 1.0, %v3304_v55  ;;  %v1947_v49 = vmul.f32 1.442695, %v1828_v11  ;;  %v1829_v13 = vsub.f32 0.0, %v4618_v62 }
 0x4d1   : > { %v3308_v30 = vpop.eup %3307  ;;  %3327 = vrcp.f32 %v2007_v6  ;;  %v2009_v19 = vadd.f32 1.0, %v3306_v17  ;;  %v1698_v14 = vmul.f32 %v3395_v58, %v4858_v44  ;;  %v4626_v36 = vadd.f32 %v3396_v16, %v1696_v0 }
 0x4d2   : > { %v3310_v40 = vpop.eup %3309  ;;  %3329 = vrcp.f32 %v2008_v5  ;;  %v2010_v42 = vadd.f32 1.0, %v3308_v30  ;;  %v1699_v18 = vmul.f32 %v3395_v58, %v4859_v22  ;;  %v1830_v59 = vsub.f32 0.0, %v4621_v12 }
 0x4d3   : > { %v3312_v45 = vpop.eup %3311  ;;  %3331 = vrcp.f32 %v2009_v19  ;;  %v2011_v2 = vadd.f32 1.0, %v3310_v40  ;;  %v4630_v21 = vadd.f32 %v3396_v16, %v1697_v34  ;;  %v4632_v10 = vadd.f32 %v3396_v16, %v1698_v14 }
 0x4d4   : > { %v3314_v31 = vpop.eup %3313  ;;  %3333 = vrcp.f32 %v2010_v42  ;;  %v2012_v20 = vadd.f32 1.0, %v3312_v45  ;;  %v1700_v1 = vmul.f32 %v3395_v58, %v4860_v32  ;;  %v4635_v8 = vadd.f32 %v3396_v16, %v1699_v18 }
 0x4d5   : > { %v3316_v52 = vpop.eup %3315  ;;  %3335 = vrcp.f32 %v2011_v2  ;;  %v2013_v24 = vadd.f32 1.0, %v3314_v31  ;;  %v1701_v55 = vmul.f32 %v3395_v58, %v4861_v28  ;;  %v1831_v11 = vsub.f32 0.0, %v4626_v36 }
 0x4d6   : > { %v3318_v26 = vpop.eup %3317  ;;  %3337 = vrcp.f32 %v2012_v20  ;;  %v2014_v60 = vadd.f32 1.0, %v3316_v52  ;;  %v4640_v17 = vadd.f32 %v3396_v16, %v1700_v1  ;;  %v1832_v19 = vsub.f32 0.0, %v4630_v21 }
 0x4d7   : > { %v3320_v54 = vpop.eup %3319  ;;  %3339 = vrcp.f32 %v2013_v24  ;;  %v2015_v50 = vadd.f32 1.0, %v3318_v26  ;;  %v4644_v29 = vadd.f32 %v3396_v16, %v1701_v55  ;;  %v1833_v40 = vsub.f32 0.0, %v4632_v10 }
 0x4d8   : > { %v3322_v41 = vpop.eup %3321  ;;  %3341 = vrcp.f32 %v2014_v60  ;;  %v2016_v37 = vadd.f32 1.0, %v3320_v54  ;;  %v1834_v34 = vsub.f32 0.0, %v4635_v8 }
 0x4d9   : > { %v3324_v6 = vpop.eup %3323  ;;  %v2196_v35 = vmul.f32 %v3322_v41, %v4466_v23  ;;  %3343 = vrcp.f32 %v2015_v50  ;;  %v1949_v23 = vmul.f32 1.442695, %v1829_v13 }
 0x4da   : > { %v3326_v5 = vpop.eup %3325  ;;  %v2197_v30 = vmul.f32 %v3324_v6, %v4484_v53  ;;  %3345 = vrcp.f32 %v2016_v37  ;;  %v1951_v53 = vmul.f32 1.442695, %v1830_v59  ;;  %v1959_v14 = vmul.f32 1.442695, %v1834_v34 }
 0x4db   : > { %v3328_v0 = vpop.eup %3327  ;;  %2260 = vst [vmem:[%s3660_s17 + $0x138] sm:$0xff] %v2196_v35  ;;  %v2198_v58 = vmul.f32 %v3326_v5, %v4489_v33  ;;  %3347 = vpow2.f32 %v1941_v63  ;;  %v1953_v33 = vmul.f32 1.442695, %v1831_v11  ;;  %v1835_v63 = vsub.f32 0.0, %v4640_v17 }
 0x4dc   : > { %v3330_v42 = vpop.eup %3329  ;;  %2261 = vst [vmem:[%s3660_s17 + $0x140] sm:$0xff] %v2197_v30  ;;  %v2199_v3 = vmul.f32 %v3328_v0, %v4501_v9  ;;  %3349 = vpow2.f32 %v1943_v48  ;;  %v1955_v9 = vmul.f32 1.442695, %v1832_v19  ;;  %v1836_v48 = vsub.f32 0.0, %v4644_v29 }
 0x4dd   : > { %v3332_v16 = vpop.eup %3331  ;;  %2262 = vst [vmem:[%s3660_s17 + $0x148] sm:$0xff] %v2198_v58  ;;  %v2200_v45 = vmul.f32 %v3330_v42, %v4505_v7  ;;  %3351 = vpow2.f32 %v1945_v15  ;;  %v1957_v7 = vmul.f32 1.442695, %v1833_v40  ;;  %v1961_v52 = vmul.f32 1.442695, %v1835_v63 }
 0x4de   : > { %v3334_v2 = vpop.eup %3333  ;;  %2263 = vst [vmem:[%s3660_s17 + $0x150] sm:$0xff] %v2199_v3  ;;  %v2201_v31 = vmul.f32 %v3332_v16, %v4520_v47  ;;  %3353 = vpow2.f32 %v1947_v49  ;;  %v1963_v22 = vmul.f32 1.442695, %v1836_v48 }
 0x4df   : > { %v3336_v20 = vpop.eup %3335  ;;  %2264 = vst [vmem:[%s3660_s17 + $0x158] sm:$0xff] %v2200_v45  ;;  %v2202_v13 = vmul.f32 %v3334_v2, %v4523_v4  ;;  %3355 = vpow2.f32 %v1949_v23 }
 0x4e0   : > { %v3338_v15 = vpop.eup %3337  ;;  %2265 = vst [vmem:[%s3660_s17 + $0x160] sm:$0xff] %v2201_v31  ;;  %v2203_v44 = vmul.f32 %v3336_v20, %v4532_v57  ;;  %3357 = vpow2.f32 %v1951_v53 }
 0x4e1   : > { %v3340_v47 = vpop.eup %3339  ;;  %2266 = vst [vmem:[%s3660_s17 + $0x168] sm:$0xff] %v2202_v13  ;;  %v2204_v49 = vmul.f32 %v3338_v15, %v4535_v51  ;;  %3359 = vpow2.f32 %v1953_v33 }
 0x4e2   : > { %v3342_v24 = vpop.eup %3341  ;;  %2267 = vst [vmem:[%s3660_s17 + $0x170] sm:$0xff] %v2203_v44  ;;  %v2205_v4 = vmul.f32 %v3340_v47, %v4543_v27  ;;  %3361 = vpow2.f32 %v1955_v9 }
 0x4e3   : > { %v3344_v18 = vpop.eup %3343  ;;  %2268 = vst [vmem:[%s3660_s17 + $0x178] sm:$0xff] %v2204_v49  ;;  %v2206_v57 = vmul.f32 %v3342_v24, %v4547_v43  ;;  %3363 = vpow2.f32 %v1957_v7 }
 0x4e4   : > { %v3346_v26 = vpop.eup %3345  ;;  %2269 = vst [vmem:[%s3660_s17 + $0x180] sm:$0xff] %v2205_v4  ;;  %v2207_v51 = vmul.f32 %v3344_v18, %v4560_v56  ;;  %3365 = vpow2.f32 %v1959_v14 }
 0x4e5   : > { %v3348_v60 = vpop.eup %3347  ;;  %2270 = vst [vmem:[%s3660_s17 + $0x188] sm:$0xff] %v2206_v57  ;;  %v2208_v59 = vmul.f32 %v3346_v26, %v4567_v39  ;;  %3367 = vpow2.f32 %v1961_v52 }
 0x4e6   : > { %v3350_v27 = vpop.eup %3349  ;;  %2271 = vst [vmem:[%s3660_s17 + $0x190] sm:$0xff] %v2207_v51  ;;  %v2017_v54 = vadd.f32 1.0, %v3348_v60  ;;  %3369 = vpow2.f32 %v1963_v22 }
 0x4e7   : > { %v3352_v50 = vpop.eup %3351  ;;  %2272 = vst [vmem:[%s3660_s17 + $0x198] sm:$0xff] %v2208_v59  ;;  %v2018_v32 = vadd.f32 1.0, %v3350_v27 }
 0x4e8   : > { %v3354_v1 = vpop.eup %3353  ;;  %3371 = vrcp.f32 %v2017_v54  ;;  %v2019_v43 = vadd.f32 1.0, %v3352_v50 }
 0x4e9   : > { %v3356_v41 = vpop.eup %3355  ;;  %3373 = vrcp.f32 %v2018_v32  ;;  %v2020_v37 = vadd.f32 1.0, %v3354_v1 }
 0x4ea   : > { %v3358_v56 = vpop.eup %3357  ;;  %3375 = vrcp.f32 %v2019_v43  ;;  %v2021_v28 = vadd.f32 1.0, %v3356_v41 }
 0x4eb   : > { %v3360_v55 = vpop.eup %3359  ;;  %3377 = vrcp.f32 %v2020_v37  ;;  %v2022_v39 = vadd.f32 1.0, %v3358_v56 }
 0x4ec   : > { %v3362_v6 = vpop.eup %3361  ;;  %3379 = vrcp.f32 %v2021_v28  ;;  %v2023_v35 = vadd.f32 1.0, %v3360_v55 }
 0x4ed   : > { %v3364_v11 = vpop.eup %3363  ;;  %3381 = vrcp.f32 %v2022_v39  ;;  %v2024_v5 = vadd.f32 1.0, %v3362_v6 }
 0x4ee   : > { %v3366_v30 = vpop.eup %3365  ;;  %3383 = vrcp.f32 %v2023_v35  ;;  %v2025_v19 = vadd.f32 1.0, %v3364_v11 }
 0x4ef   : > { %v3368_v0 = vpop.eup %3367  ;;  %3385 = vrcp.f32 %v2024_v5  ;;  %v2026_v58 = vadd.f32 1.0, %v3366_v30 }
 0x4f0   : > { %v3370_v23 = vpop.eup %3369  ;;  %3387 = vrcp.f32 %v2025_v19  ;;  %v2027_v40 = vadd.f32 1.0, %v3368_v0 }
 0x4f1   : > { %3389 = vrcp.f32 %v2026_v58  ;;  %v2028_v42 = vadd.f32 1.0, %v3370_v23 }
 0x4f2   : > { %v3372_v3 = vpop.eup %3371  ;;  %3391 = vrcp.f32 %v2027_v40 }
 0x4f3   : > { %v3374_v53 = vpop.eup %3373  ;;  %v2209_v34 = vmul.f32 %v3372_v3, %v4590_v38  ;;  %3393 = vrcp.f32 %v2028_v42 }
 0x4f4   : > { %v3376_v16 = vpop.eup %3375  ;;  %v2210_v45 = vmul.f32 %v3374_v53, %v4597_v61 }
 0x4f5   : > { %v3378_v33 = vpop.eup %3377  ;;  %2273 = vst [vmem:[%s3660_s17 + $0x1a0] sm:$0xff] %v2209_v34  ;;  %v2211_v63 = vmul.f32 %v3376_v16, %v4604_v46 }
 0x4f6   : > { %v3380_v2 = vpop.eup %3379  ;;  %2274 = vst [vmem:[%s3660_s17 + $0x1a8] sm:$0xff] %v2210_v45  ;;  %v2212_v31 = vmul.f32 %v3378_v33, %v4607_v25 }
 0x4f7   : > { %v3382_v9 = vpop.eup %3381  ;;  %2275 = vst [vmem:[%s3660_s17 + $0x1b0] sm:$0xff] %v2211_v63  ;;  %v2213_v38 = vmul.f32 %v3380_v2, %v4618_v62 }
 0x4f8   : > { %v3384_v48 = vpop.eup %3383  ;;  %2276 = vst [vmem:[%s3660_s17 + $0x1b8] sm:$0xff] %v2212_v31  ;;  %v2214_v61 = vmul.f32 %v3382_v9, %v4621_v12 }
 0x4f9   : > { %v3386_v20 = vpop.eup %3385  ;;  %2277 = vst [vmem:[%s3660_s17 + $0x1c0] sm:$0xff] %v2213_v38  ;;  %v2215_v46 = vmul.f32 %v3384_v48, %v4626_v36 }
 0x4fa   : > { %v3388_v13 = vpop.eup %3387  ;;  %2278 = vst [vmem:[%s3660_s17 + $0x1c8] sm:$0xff] %v2214_v61  ;;  %v2216_v25 = vmul.f32 %v3386_v20, %v4630_v21 }
 0x4fb   : > { %v3390_v7 = vpop.eup %3389  ;;  %2279 = vst [vmem:[%s3660_s17 + $0x1d0] sm:$0xff] %v2215_v46  ;;  %v2217_v62 = vmul.f32 %v3388_v13, %v4632_v10 }
 0x4fc   : > { %v3392_v15 = vpop.eup %3391  ;;  %2280 = vst [vmem:[%s3660_s17 + $0x1d8] sm:$0xff] %v2216_v25  ;;  %v2218_v44 = vmul.f32 %v3390_v7, %v4635_v8 }
 0x4fd   : > { %v3394_v12 = vpop.eup %3393  ;;  %2281 = vst [vmem:[%s3660_s17 + $0x1e0] sm:$0xff] %v2217_v62  ;;  %v2219_v14 = vmul.f32 %v3392_v15, %v4640_v17 }
 0x4fe   : > { %2282 = vst [vmem:[%s3660_s17 + $0x1e8] sm:$0xff] %v2218_v44  ;;  %v2220_v36 = vmul.f32 %v3394_v12, %v4644_v29 }
 0x4ff   : > { %2283 = vst [vmem:[%s3660_s17 + $0x1f0] sm:$0xff] %v2219_v14 }
 0x500   : > { %2284 = vst [vmem:[%s3660_s17 + $0x1f8] sm:$0xff] %v2220_v36 }
 0x501 PF: > { %s18_s25 = sadd.s32 1, %s3499_s25   ;;  %s4862_s21 = smov %s3491_s23 }
 0x502   : > { %p15_p2 = scmp.ge.s32.totalorder %s18_s25, 10   ;;  %s4863_s22 = smov %s3495_s24 }
 0x503   : > { %s4864_s23 = smov %s4867_s27  ;;  %s4865_s24 = smov %s4871_s28 }
 0x504   :  { %17 = sbr.rel (!%p15_p2) target bundleno = 4 (0x4), region = 99 }
 0x50b   :  { %2310 = vsyncpa [#allocation7], 1 }
 0x50c   :  { %2312 = vsyncpa [#allocation7 + $0x1], 1 }
 0x50d   :  { %2313 = vsyncpa [#allocation9], 1 }

</bundles_post_ra>
